<compile_context>
chip_gen: v7x
topology: tpu7x:2x2x1
jax: 0.10.0
libtpu: 0.0.40
codegen_flags: <defaults>
</compile_context>

<pallas_src>
import jax
import jax.numpy as jnp
from jax import lax
from jax.experimental import pallas as pl
from jax.experimental.pallas import tpu as pltpu

EXPANSION = 4
BN_EPS = 1e-5


# ---------------------------------------------------------------------------
# Fused FishBlock kernel (one grid step == one image)
# ---------------------------------------------------------------------------
def _make_fishblock_kernel(H, W, H_out, W_out, stride, dilation, pad,
                           residual_kind, k):
    """Builds the fused kernel body for a fixed static configuration."""

    def _sds(start, size):
        # strided dynamic slice (plain slice when stride == 1)
        return pl.ds(start, size, stride) if stride > 1 else pl.ds(start, size)

    def kernel(*refs):
        if residual_kind == 'downsample':
            (x_ref, s1_ref, b1_ref, w1_ref, b2_ref, w2_ref, b3_ref, w3_ref,
             sd_ref, bd_ref, wd_ref, o_ref, upad_ref) = refs
        elif residual_kind == 'up' and k > 1:
            (x_ref, s1_ref, b1_ref, w1_ref, b2_ref, w2_ref, b3_ref, w3_ref,
             sq_ref, o_ref, upad_ref) = refs
        else:
            (x_ref, s1_ref, b1_ref, w1_ref, b2_ref, w2_ref, b3_ref, w3_ref,
             o_ref, upad_ref) = refs

        cin = x_ref.shape[-1]
        btnk = w1_ref.shape[-1]

        # ---- stage 1: BN1 -> ReLU -> conv1 (1x1, BN2 scale folded) -> +b2 -> ReLU
        x3 = x_ref[...]                                     # (H, W, Cin) f32
        x2 = x3.reshape(H * W, cin)
        t = jnp.maximum(x2 * s1_ref[...] + b1_ref[...], 0.0)
        h1 = jnp.dot(t.astype(jnp.bfloat16), w1_ref[...],
                     preferred_element_type=jnp.float32)
        u = jnp.maximum(h1 + b2_ref[...], 0.0)              # (H*W, B) f32

        # stage-1 activation only ever lives in a zero-padded VMEM scratch
        upad_ref[...] = jnp.zeros_like(upad_ref)
        upad_ref[pad:pad + H, pad:pad + W, :] = u.reshape(H, W, btnk)

        # ---- stage 2: 3x3 conv (stride, dilation) as 9 accumulating MXU matmuls
        #      (BN3 scale already folded into the tap weights)
        acc = None
        for ky in range(3):
            for kx in range(3):
                tap = upad_ref[_sds(ky * dilation, H_out),
                               _sds(kx * dilation, W_out), :]
                tap2 = tap.reshape(H_out * W_out, btnk).astype(jnp.bfloat16)
                d = jnp.dot(tap2, w2_ref[3 * ky + kx],
                            preferred_element_type=jnp.float32)
                acc = d if acc is None else acc + d
        v = jnp.maximum(acc + b3_ref[...], 0.0)              # (Ho*Wo, B) f32

        # ---- stage 3: conv3 (1x1)
        out = jnp.dot(v.astype(jnp.bfloat16), w3_ref[...],
                      preferred_element_type=jnp.float32)    # (Ho*Wo, planes)

        # ---- residual branch (fused: never touches HBM)
        if residual_kind == 'downsample':
            if stride > 1:
                xs = x_ref[_sds(0, H_out), _sds(0, W_out), :]
            else:
                xs = x3
            r = xs.reshape(H_out * W_out, cin)
            r = jnp.maximum(r * sd_ref[...] + bd_ref[...], 0.0)
            res = jnp.dot(r.astype(jnp.bfloat16), wd_ref[...],
                          preferred_element_type=jnp.float32)
        elif residual_kind == 'up':
            # squeeze_idt: sum channel groups of size k (stride == 1 only)
            if k == 1:
                res = x2
            else:
                res = jnp.dot(x2.astype(jnp.bfloat16), sq_ref[...],
                              preferred_element_type=jnp.float32)
        else:  # identity residual (in_planes == planes, stride == 1)
            res = x2

        o_ref[...] = out + res

    return kernel


# ---------------------------------------------------------------------------
# Parameter construction (deterministic, synthetic) + BN folding
# ---------------------------------------------------------------------------
def init_fishblock_params(key, in_planes, planes, *, stride=2, mode='DOWN'):
    """Returns raw (PyTorch-layout) parameters for FishBlock."""
    btnk = planes // EXPANSION
    keys = jax.random.split(key, 8)

    def bn_params(kk, c):
        k1, k2, k3, k4 = jax.random.split(kk, 4)
        gamma = jax.random.uniform(k1, (c,), minval=0.5, maxval=1.5)
        beta = 0.1 * jax.random.normal(k2, (c,))
        mean = 0.1 * jax.random.normal(k3, (c,))
        var = jax.random.uniform(k4, (c,), minval=0.5, maxval=1.5)
        return (gamma, beta, mean, var)

    def conv_w(kk, cout, cin, kh, kw):
        fan_in = cin * kh * kw
        return jax.random.normal(kk, (cout, cin, kh, kw)) / jnp.sqrt(float(fan_in))

    raw = {
        'bn1': bn_params(keys[0], in_planes),
        'conv1': conv_w(keys[1], btnk, in_planes, 1, 1),
        'bn2': bn_params(keys[2], btnk),
        'conv2': conv_w(keys[3], btnk, btnk, 3, 3),
        'bn3': bn_params(keys[4], btnk),
        'conv3': conv_w(keys[5], planes, btnk, 1, 1),
    }
    if mode.upper() != 'UP' and (in_planes != planes or stride > 1):
        raw['bnd'] = bn_params(keys[6], in_planes)
        raw['convd'] = conv_w(keys[7], planes, in_planes, 1, 1)
    return raw


def _fold_bn(bn):
    gamma, beta, mean, var = bn
    scale = gamma / jnp.sqrt(var + BN_EPS)
    shift = beta - mean * scale
    return scale[None, :], shift[None, :]          # (1, C)


def prepare_kernel_params(raw, *, mode='DOWN', k=1):
    p = {}
    s1, b1 = _fold_bn(raw['bn1'])
    s2, b2 = _fold_bn(raw['bn2'])
    s3, b3 = _fold_bn(raw['bn3'])
    p['s1'], p['b1'] = s1, b1
    p['b2'], p['b3'] = b2, b3

    btnk = raw['conv2'].shape[0]
    cin = raw['conv1'].shape[1]

    w1 = jnp.transpose(raw['conv1'][:, :, 0, 0], (1, 0))            # (Cin, B)
    p['w1s2'] = (w1 * s2).astype(jnp.bfloat16)                      # fold BN2 scale
    w2 = jnp.transpose(raw['conv2'], (2, 3, 1, 0)).reshape(9, btnk, btnk)
    p['w2s3'] = (w2 * s3).astype(jnp.bfloat16)                      # fold BN3 scale
    p['w3'] = jnp.transpose(raw['conv3'][:, :, 0, 0], (1, 0)).astype(jnp.bfloat16)

    if 'convd' in raw:
        sd, bd = _fold_bn(raw['bnd'])
        p['sd'], p['bd'] = sd, bd
        p['wd'] = jnp.transpose(raw['convd'][:, :, 0, 0], (1, 0)).astype(jnp.bfloat16)

    if mode.upper() == 'UP' and k > 1:
        groups = (jnp.arange(cin) // k)[:, None] == jnp.arange(cin // k)[None, :]
        p['sq'] = groups.astype(jnp.bfloat16)                       # (Cin, Cin//k)
    return p


# ---------------------------------------------------------------------------
# FishBlock forward (wrapper around the fused Pallas kernel)
# ---------------------------------------------------------------------------
def fish_block_forward(x_nchw, params, *, stride=2, mode='DOWN', k=1, dilation=1):
    mode = mode.upper()
    n, cin, h, w = x_nchw.shape
    btnk = params['w1s2'].shape[1]
    planes = params['w3'].shape[1]

    pad = dilation
    h_out = (h + 2 * pad - 2 * dilation - 1) // stride + 1
    w_out = (w + 2 * pad - 2 * dilation - 1) // stride + 1

    if mode == 'UP':
        if stride != 1:
            raise ValueError("FishBlock UP mode requires stride == 1 "
                             "(residual is not spatially downsampled).")
        residual_kind = 'up'
    elif 'wd' in params:
        residual_kind = 'downsample'
    else:
        residual_kind = 'identity'

    x = jnp.transpose(x_nchw, (0, 2, 3, 1)).astype(jnp.float32)     # NHWC (layout glue)

    kernel = _make_fishblock_kernel(h, w, h_out, w_out, stride, dilation, pad,
                                    residual_kind, k)

    def _const_spec(arr):
        zeros = (0,) * arr.ndim
        return pl.BlockSpec(arr.shape, lambda i: zeros)   # DMA once, stays resident

    param_list = [params['s1'], params['b1'], params['w1s2'], params['b2'],
                  params['w2s3'], params['b3'], params['w3']]
    if residual_kind == 'downsample':
        param_list += [params['sd'], params['bd'], params['wd']]
    elif residual_kind == 'up' and k > 1:
        param_list += [params['sq']]

    in_specs = [pl.BlockSpec((None, h, w, cin), lambda i: (i, 0, 0, 0))]
    in_specs += [_const_spec(a) for a in param_list]
    out_specs = pl.BlockSpec((None, h_out * w_out, planes), lambda i: (i, 0, 0))

    param_bytes = sum(int(a.size) * a.dtype.itemsize for a in param_list)
    x_blk_bytes = h * w * cin * 4
    o_blk_bytes = h_out * w_out * planes * 4
    scratch_bytes = (h + 2 * pad) * (w + 2 * pad) * btnk * 4
    vmem_limit = int(min(max(2 * (x_blk_bytes + o_blk_bytes) + scratch_bytes
                             + param_bytes + (4 << 20), 32 << 20), 64 << 20))

    flops = 2 * n * (h * w * cin * btnk
                     + h_out * w_out * 9 * btnk * btnk
                     + h_out * w_out * btnk * planes)
    if residual_kind == 'downsample':
        flops += 2 * n * h_out * w_out * cin * planes
    cost = pl.CostEstimate(flops=flops, transcendentals=0,
                           bytes_accessed=int(n * (x_blk_bytes + o_blk_bytes)
                                              + param_bytes))

    out = pl.pallas_call(
        kernel,
        out_shape=jax.ShapeDtypeStruct((n, h_out * w_out, planes), jnp.float32),
        grid=(n,),
        in_specs=in_specs,
        out_specs=out_specs,
        scratch_shapes=[pltpu.VMEM((h + 2 * pad, w + 2 * pad, btnk), jnp.float32)],
        compiler_params=pltpu.CompilerParams(
            dimension_semantics=("parallel",),      # v7x: 2 TCs split the batch
            vmem_limit_bytes=vmem_limit),
        cost_estimate=cost,
    )(x, *param_list)

    # TODO(synk): for very large spatial extents, additionally tile the output rows
    #             (halo handling) instead of one-image-per-grid-step blocks.
    out = out.reshape(n, h_out, w_out, planes)
    return jnp.transpose(out, (0, 3, 1, 2))          # back to NCHW


# ---------------------------------------------------------------------------
# Pure-JAX reference (XLA convolutions) for correctness checking
# ---------------------------------------------------------------------------
def _bn_ref(x, bn):
    gamma, beta, mean, var = bn
    return (x - mean) / jnp.sqrt(var + BN_EPS) * gamma + beta


def fish_block_reference(x_nchw, raw, *, stride=2, mode='DOWN', k=1, dilation=1):
    dn = ('NHWC', 'HWIO', 'NHWC')
    x = jnp.transpose(x_nchw, (0, 2, 3, 1)).astype(jnp.float32)
    t = jax.nn.relu(_bn_ref(x, raw['bn1']))
    h1 = lax.conv_general_dilated(t, jnp.transpose(raw['conv1'], (2, 3, 1, 0)),
                                  (1, 1), 'VALID', dimension_numbers=dn)
    u = jax.nn.relu(_bn_ref(h1, raw['bn2']))
    h2 = lax.conv_general_dilated(u, jnp.transpose(raw['conv2'], (2, 3, 1, 0)),
                                  (stride, stride),
                                  [(dilation, dilation), (dilation, dilation)],
                                  rhs_dilation=(dilation, dilation),
                                  dimension_numbers=dn)
    v = jax.nn.relu(_bn_ref(h2, raw['bn3']))
    h3 = lax.conv_general_dilated(v, jnp.transpose(raw['conv3'], (2, 3, 1, 0)),
                                  (1, 1), 'VALID', dimension_numbers=dn)
    if mode.upper() == 'UP':
        n_, hh, ww, c_ = x.shape
        res = x.reshape(n_, hh, ww, c_ // k, k).sum(-1)
    elif 'convd' in raw:
        r = jax.nn.relu(_bn_ref(x, raw['bnd']))
        res = lax.conv_general_dilated(r, jnp.transpose(raw['convd'], (2, 3, 1, 0)),
                                       (stride, stride), 'VALID', dimension_numbers=dn)
    else:
        res = x
    return jnp.transpose(h3 + res, (0, 3, 1, 2))


# ---------------------------------------------------------------------------
if __name__ == "__main__":
    key = jax.random.PRNGKey(0)

    configs = [
        # main config: strided DOWN block with BN+ReLU+1x1 downsample residual
        dict(in_planes=8, planes=16, stride=2, mode='DOWN', k=1, dilation=1,
             N=2, H=16, W=16),
        # stride-1 block with identity residual
        dict(in_planes=16, planes=16, stride=1, mode='DOWN', k=1, dilation=1,
             N=2, H=16, W=16),
    ]

    for cfg in configs:
        key, kx, kp = jax.random.split(key, 3)
        x = jax.random.normal(kx, (cfg['N'], cfg['in_planes'], cfg['H'], cfg['W']),
                              dtype=jnp.float32)
        raw = init_fishblock_params(kp, cfg['in_planes'], cfg['planes'],
                                    stride=cfg['stride'], mode=cfg['mode'])
        params = prepare_kernel_params(raw, mode=cfg['mode'], k=cfg['k'])

        out = fish_block_forward(x, params, stride=cfg['stride'], mode=cfg['mode'],
                                 k=cfg['k'], dilation=cfg['dilation'])
        out = jax.block_until_ready(out)

        h_out = (cfg['H'] - 1) // cfg['stride'] + 1
        w_out = (cfg['W'] - 1) // cfg['stride'] + 1
        assert out.shape == (cfg['N'], cfg['planes'], h_out, w_out), out.shape

        ref = fish_block_reference(x, raw, stride=cfg['stride'], mode=cfg['mode'],
                                   k=cfg['k'], dilation=cfg['dilation'])
        rel_err = float(jnp.max(jnp.abs(out - ref)) / (jnp.max(jnp.abs(ref)) + 1e-6))
        if rel_err > 5e-2:
            raise AssertionError(
                f"Pallas FishBlock mismatch vs reference for cfg={cfg}: "
                f"normalized max err={rel_err}")

    print("KERNEL_OK")
</pallas_src>

<mosaic_0001>
module attributes {stable_mosaic.version = 11 : i64} {
  func.func @kernel(%arg0: i32, %arg1: memref<1x16x16x8xf32, #tpu.memory_space<vmem>>, %arg2: memref<1x8xf32, #tpu.memory_space<vmem>>, %arg3: memref<1x8xf32, #tpu.memory_space<vmem>>, %arg4: memref<8x4xbf16, #tpu.memory_space<vmem>>, %arg5: memref<1x4xf32, #tpu.memory_space<vmem>>, %arg6: memref<9x4x4xbf16, #tpu.memory_space<vmem>>, %arg7: memref<1x4xf32, #tpu.memory_space<vmem>>, %arg8: memref<4x16xbf16, #tpu.memory_space<vmem>>, %arg9: memref<1x8xf32, #tpu.memory_space<vmem>>, %arg10: memref<1x8xf32, #tpu.memory_space<vmem>>, %arg11: memref<8x16xbf16, #tpu.memory_space<vmem>>, %arg12: memref<1x64x16xf32, #tpu.memory_space<vmem>>, %arg13: memref<18x18x4xf32, #tpu.memory_space<vmem>>) attributes {dimension_semantics = [#tpu.dimension_semantics<parallel>], iteration_bounds = array<i64: 2>, scalar_prefetch = 0 : i64, scratch_operands = 1 : i64, tpu.core_type = #tpu.core_type<tc>, window_params = [{transform_indices = @transform_0, window_bounds = array<i64: 1, 16, 16, 8>}, {pipeline_mode = #tpu.pipeline_mode<synchronous>, transform_indices = @transform_1, window_bounds = array<i64: 1, 8>}, {pipeline_mode = #tpu.pipeline_mode<synchronous>, transform_indices = @transform_2, window_bounds = array<i64: 1, 8>}, {pipeline_mode = #tpu.pipeline_mode<synchronous>, transform_indices = @transform_3, window_bounds = array<i64: 8, 4>}, {pipeline_mode = #tpu.pipeline_mode<synchronous>, transform_indices = @transform_4, window_bounds = array<i64: 1, 4>}, {pipeline_mode = #tpu.pipeline_mode<synchronous>, transform_indices = @transform_5, window_bounds = array<i64: 9, 4, 4>}, {pipeline_mode = #tpu.pipeline_mode<synchronous>, transform_indices = @transform_6, window_bounds = array<i64: 1, 4>}, {pipeline_mode = #tpu.pipeline_mode<synchronous>, transform_indices = @transform_7, window_bounds = array<i64: 4, 16>}, {pipeline_mode = #tpu.pipeline_mode<synchronous>, transform_indices = @transform_8, window_bounds = array<i64: 1, 8>}, {pipeline_mode = #tpu.pipeline_mode<synchronous>, transform_indices = @transform_9, window_bounds = array<i64: 1, 8>}, {pipeline_mode = #tpu.pipeline_mode<synchronous>, transform_indices = @transform_10, window_bounds = array<i64: 8, 16>}, {transform_indices = @transform_11, window_bounds = array<i64: 1, 64, 16>}]} {
    %c0 = arith.constant 0 : index
    %c0_0 = arith.constant 0 : index
    %c0_1 = arith.constant 0 : index
    %c0_2 = arith.constant 0 : index
    %0 = vector.load %arg1[%c0, %c0_0, %c0_1, %c0_2] : memref<1x16x16x8xf32, #tpu.memory_space<vmem>>, vector<1x16x16x8xf32>
    %1 = vector.shape_cast %0 : vector<1x16x16x8xf32> to vector<16x16x8xf32>
    %2 = vector.shape_cast %1 : vector<16x16x8xf32> to vector<256x8xf32>
    %c0_3 = arith.constant 0 : index
    %c0_4 = arith.constant 0 : index
    %3 = vector.load %arg2[%c0_3, %c0_4] : memref<1x8xf32, #tpu.memory_space<vmem>>, vector<1x8xf32>
    %4 = vector.broadcast %3 : vector<1x8xf32> to vector<256x8xf32>
    %5 = arith.mulf %2, %4 : vector<256x8xf32>
    %c0_5 = arith.constant 0 : index
    %c0_6 = arith.constant 0 : index
    %6 = vector.load %arg3[%c0_5, %c0_6] : memref<1x8xf32, #tpu.memory_space<vmem>>, vector<1x8xf32>
    %7 = vector.broadcast %6 : vector<1x8xf32> to vector<256x8xf32>
    %8 = arith.addf %5, %7 : vector<256x8xf32>
    %cst = arith.constant 0.000000e+00 : f32
    %9 = vector.broadcast %cst : f32 to vector<256x8xf32>
    %10 = arith.maximumf %8, %9 : vector<256x8xf32>
    %11 = arith.truncf %10 : vector<256x8xf32> to vector<256x8xbf16>
    %c0_7 = arith.constant 0 : index
    %c0_8 = arith.constant 0 : index
    %12 = vector.load %arg4[%c0_7, %c0_8] : memref<8x4xbf16, #tpu.memory_space<vmem>>, vector<8x4xbf16>
    %cst_9 = arith.constant dense<0.000000e+00> : vector<256x4xf32>
    %13 = tpu.matmul %11, %12, %cst_9 {dimension_numbers = #tpu.dot_dimension_numbers<[1], [0], [0], [1], [0, 0, 1, 1], [], []>} : vector<256x8xbf16>, vector<8x4xbf16>, vector<256x4xf32> -> vector<256x4xf32>
    %c0_10 = arith.constant 0 : index
    %c0_11 = arith.constant 0 : index
    %14 = vector.load %arg5[%c0_10, %c0_11] : memref<1x4xf32, #tpu.memory_space<vmem>>, vector<1x4xf32>
    %15 = vector.broadcast %14 : vector<1x4xf32> to vector<256x4xf32>
    %16 = arith.addf %13, %15 : vector<256x4xf32>
    %cst_12 = arith.constant 0.000000e+00 : f32
    %17 = vector.broadcast %cst_12 : f32 to vector<256x4xf32>
    %18 = arith.maximumf %16, %17 : vector<256x4xf32>
    %cst_13 = arith.constant 0.000000e+00 : f32
    %19 = vector.broadcast %cst_13 : f32 to vector<18x18x4xf32>
    %c0_14 = arith.constant 0 : index
    %c0_15 = arith.constant 0 : index
    %c0_16 = arith.constant 0 : index
    %20 = vector.load %arg13[%c0_14, %c0_15, %c0_16] : memref<18x18x4xf32, #tpu.memory_space<vmem>>, vector<18x18x4xf32>
    tpu.vector_store %arg13[%c0_14, %c0_15, %c0_16], %19 {strides = array<i32>} : memref<18x18x4xf32, #tpu.memory_space<vmem>>, vector<18x18x4xf32>,
    %21 = vector.shape_cast %18 : vector<256x4xf32> to vector<16x16x4xf32>
    %c1 = arith.constant 1 : index
    %c1_17 = arith.constant 1 : index
    %c0_18 = arith.constant 0 : index
    %22 = vector.load %arg13[%c1, %c1_17, %c0_18] : memref<18x18x4xf32, #tpu.memory_space<vmem>>, vector<16x16x4xf32>
    tpu.vector_store %arg13[%c1, %c1_17, %c0_18], %21 {strides = array<i32>} : memref<18x18x4xf32, #tpu.memory_space<vmem>>, vector<16x16x4xf32>,
    %c0_19 = arith.constant 0 : index
    %c0_20 = arith.constant 0 : index
    %c0_21 = arith.constant 0 : index
    %23 = tpu.strided_load %arg13[%c0_19, %c0_20, %c0_21] {strides = array<i32: 2, 2, 1>} : memref<18x18x4xf32, #tpu.memory_space<vmem>>, vector<8x8x4xf32>
    %24 = vector.shape_cast %23 : vector<8x8x4xf32> to vector<64x4xf32>
    %25 = arith.truncf %24 : vector<64x4xf32> to vector<64x4xbf16>
    %c0_22 = arith.constant 0 : index
    %c0_23 = arith.constant 0 : index
    %c0_24 = arith.constant 0 : index
    %26 = vector.load %arg6[%c0_22, %c0_23, %c0_24] : memref<9x4x4xbf16, #tpu.memory_space<vmem>>, vector<1x4x4xbf16>
    %27 = vector.shape_cast %26 : vector<1x4x4xbf16> to vector<4x4xbf16>
    %cst_25 = arith.constant dense<0.000000e+00> : vector<64x4xf32>
    %28 = tpu.matmul %25, %27, %cst_25 {dimension_numbers = #tpu.dot_dimension_numbers<[1], [0], [0], [1], [0, 0, 1, 1], [], []>} : vector<64x4xbf16>, vector<4x4xbf16>, vector<64x4xf32> -> vector<64x4xf32>
    %c0_26 = arith.constant 0 : index
    %c1_27 = arith.constant 1 : index
    %c0_28 = arith.constant 0 : index
    %29 = tpu.strided_load %arg13[%c0_26, %c1_27, %c0_28] {strides = array<i32: 2, 2, 1>} : memref<18x18x4xf32, #tpu.memory_space<vmem>>, vector<8x8x4xf32>
    %30 = vector.shape_cast %29 : vector<8x8x4xf32> to vector<64x4xf32>
    %31 = arith.truncf %30 : vector<64x4xf32> to vector<64x4xbf16>
    %c1_29 = arith.constant 1 : index
    %c0_30 = arith.constant 0 : index
    %c0_31 = arith.constant 0 : index
    %32 = vector.load %arg6[%c1_29, %c0_30, %c0_31] : memref<9x4x4xbf16, #tpu.memory_space<vmem>>, vector<1x4x4xbf16>
    %33 = vector.shape_cast %32 : vector<1x4x4xbf16> to vector<4x4xbf16>
    %cst_32 = arith.constant dense<0.000000e+00> : vector<64x4xf32>
    %34 = tpu.matmul %31, %33, %cst_32 {dimension_numbers = #tpu.dot_dimension_numbers<[1], [0], [0], [1], [0, 0, 1, 1], [], []>} : vector<64x4xbf16>, vector<4x4xbf16>, vector<64x4xf32> -> vector<64x4xf32>
    %35 = arith.addf %28, %34 : vector<64x4xf32>
    %c0_33 = arith.constant 0 : index
    %c2 = arith.constant 2 : index
    %c0_34 = arith.constant 0 : index
    %36 = tpu.strided_load %arg13[%c0_33, %c2, %c0_34] {strides = array<i32: 2, 2, 1>} : memref<18x18x4xf32, #tpu.memory_space<vmem>>, vector<8x8x4xf32>
    %37 = vector.shape_cast %36 : vector<8x8x4xf32> to vector<64x4xf32>
    %38 = arith.truncf %37 : vector<64x4xf32> to vector<64x4xbf16>
    %c2_35 = arith.constant 2 : index
    %c0_36 = arith.constant 0 : index
    %c0_37 = arith.constant 0 : index
    %39 = vector.load %arg6[%c2_35, %c0_36, %c0_37] : memref<9x4x4xbf16, #tpu.memory_space<vmem>>, vector<1x4x4xbf16>
    %40 = vector.shape_cast %39 : vector<1x4x4xbf16> to vector<4x4xbf16>
    %cst_38 = arith.constant dense<0.000000e+00> : vector<64x4xf32>
    %41 = tpu.matmul %38, %40, %cst_38 {dimension_numbers = #tpu.dot_dimension_numbers<[1], [0], [0], [1], [0, 0, 1, 1], [], []>} : vector<64x4xbf16>, vector<4x4xbf16>, vector<64x4xf32> -> vector<64x4xf32>
    %42 = arith.addf %35, %41 : vector<64x4xf32>
    %c1_39 = arith.constant 1 : index
    %c0_40 = arith.constant 0 : index
    %c0_41 = arith.constant 0 : index
    %43 = tpu.strided_load %arg13[%c1_39, %c0_40, %c0_41] {strides = array<i32: 2, 2, 1>} : memref<18x18x4xf32, #tpu.memory_space<vmem>>, vector<8x8x4xf32>
    %44 = vector.shape_cast %43 : vector<8x8x4xf32> to vector<64x4xf32>
    %45 = arith.truncf %44 : vector<64x4xf32> to vector<64x4xbf16>
    %c3 = arith.constant 3 : index
    %c0_42 = arith.constant 0 : index
    %c0_43 = arith.constant 0 : index
    %46 = vector.load %arg6[%c3, %c0_42, %c0_43] : memref<9x4x4xbf16, #tpu.memory_space<vmem>>, vector<1x4x4xbf16>
    %47 = vector.shape_cast %46 : vector<1x4x4xbf16> to vector<4x4xbf16>
    %cst_44 = arith.constant dense<0.000000e+00> : vector<64x4xf32>
    %48 = tpu.matmul %45, %47, %cst_44 {dimension_numbers = #tpu.dot_dimension_numbers<[1], [0], [0], [1], [0, 0, 1, 1], [], []>} : vector<64x4xbf16>, vector<4x4xbf16>, vector<64x4xf32> -> vector<64x4xf32>
    %49 = arith.addf %42, %48 : vector<64x4xf32>
    %c1_45 = arith.constant 1 : index
    %c1_46 = arith.constant 1 : index
    %c0_47 = arith.constant 0 : index
    %50 = tpu.strided_load %arg13[%c1_45, %c1_46, %c0_47] {strides = array<i32: 2, 2, 1>} : memref<18x18x4xf32, #tpu.memory_space<vmem>>, vector<8x8x4xf32>
    %51 = vector.shape_cast %50 : vector<8x8x4xf32> to vector<64x4xf32>
    %52 = arith.truncf %51 : vector<64x4xf32> to vector<64x4xbf16>
    %c4 = arith.constant 4 : index
    %c0_48 = arith.constant 0 : index
    %c0_49 = arith.constant 0 : index
    %53 = vector.load %arg6[%c4, %c0_48, %c0_49] : memref<9x4x4xbf16, #tpu.memory_space<vmem>>, vector<1x4x4xbf16>
    %54 = vector.shape_cast %53 : vector<1x4x4xbf16> to vector<4x4xbf16>
    %cst_50 = arith.constant dense<0.000000e+00> : vector<64x4xf32>
    %55 = tpu.matmul %52, %54, %cst_50 {dimension_numbers = #tpu.dot_dimension_numbers<[1], [0], [0], [1], [0, 0, 1, 1], [], []>} : vector<64x4xbf16>, vector<4x4xbf16>, vector<64x4xf32> -> vector<64x4xf32>
    %56 = arith.addf %49, %55 : vector<64x4xf32>
    %c1_51 = arith.constant 1 : index
    %c2_52 = arith.constant 2 : index
    %c0_53 = arith.constant 0 : index
    %57 = tpu.strided_load %arg13[%c1_51, %c2_52, %c0_53] {strides = array<i32: 2, 2, 1>} : memref<18x18x4xf32, #tpu.memory_space<vmem>>, vector<8x8x4xf32>
    %58 = vector.shape_cast %57 : vector<8x8x4xf32> to vector<64x4xf32>
    %59 = arith.truncf %58 : vector<64x4xf32> to vector<64x4xbf16>
    %c5 = arith.constant 5 : index
    %c0_54 = arith.constant 0 : index
    %c0_55 = arith.constant 0 : index
    %60 = vector.load %arg6[%c5, %c0_54, %c0_55] : memref<9x4x4xbf16, #tpu.memory_space<vmem>>, vector<1x4x4xbf16>
    %61 = vector.shape_cast %60 : vector<1x4x4xbf16> to vector<4x4xbf16>
    %cst_56 = arith.constant dense<0.000000e+00> : vector<64x4xf32>
    %62 = tpu.matmul %59, %61, %cst_56 {dimension_numbers = #tpu.dot_dimension_numbers<[1], [0], [0], [1], [0, 0, 1, 1], [], []>} : vector<64x4xbf16>, vector<4x4xbf16>, vector<64x4xf32> -> vector<64x4xf32>
    %63 = arith.addf %56, %62 : vector<64x4xf32>
    %c2_57 = arith.constant 2 : index
    %c0_58 = arith.constant 0 : index
    %c0_59 = arith.constant 0 : index
    %64 = tpu.strided_load %arg13[%c2_57, %c0_58, %c0_59] {strides = array<i32: 2, 2, 1>} : memref<18x18x4xf32, #tpu.memory_space<vmem>>, vector<8x8x4xf32>
    %65 = vector.shape_cast %64 : vector<8x8x4xf32> to vector<64x4xf32>
    %66 = arith.truncf %65 : vector<64x4xf32> to vector<64x4xbf16>
    %c6 = arith.constant 6 : index
    %c0_60 = arith.constant 0 : index
    %c0_61 = arith.constant 0 : index
    %67 = vector.load %arg6[%c6, %c0_60, %c0_61] : memref<9x4x4xbf16, #tpu.memory_space<vmem>>, vector<1x4x4xbf16>
    %68 = vector.shape_cast %67 : vector<1x4x4xbf16> to vector<4x4xbf16>
    %cst_62 = arith.constant dense<0.000000e+00> : vector<64x4xf32>
    %69 = tpu.matmul %66, %68, %cst_62 {dimension_numbers = #tpu.dot_dimension_numbers<[1], [0], [0], [1], [0, 0, 1, 1], [], []>} : vector<64x4xbf16>, vector<4x4xbf16>, vector<64x4xf32> -> vector<64x4xf32>
    %70 = arith.addf %63, %69 : vector<64x4xf32>
    %c2_63 = arith.constant 2 : index
    %c1_64 = arith.constant 1 : index
    %c0_65 = arith.constant 0 : index
    %71 = tpu.strided_load %arg13[%c2_63, %c1_64, %c0_65] {strides = array<i32: 2, 2, 1>} : memref<18x18x4xf32, #tpu.memory_space<vmem>>, vector<8x8x4xf32>
    %72 = vector.shape_cast %71 : vector<8x8x4xf32> to vector<64x4xf32>
    %73 = arith.truncf %72 : vector<64x4xf32> to vector<64x4xbf16>
    %c7 = arith.constant 7 : index
    %c0_66 = arith.constant 0 : index
    %c0_67 = arith.constant 0 : index
    %74 = vector.load %arg6[%c7, %c0_66, %c0_67] : memref<9x4x4xbf16, #tpu.memory_space<vmem>>, vector<1x4x4xbf16>
    %75 = vector.shape_cast %74 : vector<1x4x4xbf16> to vector<4x4xbf16>
    %cst_68 = arith.constant dense<0.000000e+00> : vector<64x4xf32>
    %76 = tpu.matmul %73, %75, %cst_68 {dimension_numbers = #tpu.dot_dimension_numbers<[1], [0], [0], [1], [0, 0, 1, 1], [], []>} : vector<64x4xbf16>, vector<4x4xbf16>, vector<64x4xf32> -> vector<64x4xf32>
    %77 = arith.addf %70, %76 : vector<64x4xf32>
    %c2_69 = arith.constant 2 : index
    %c2_70 = arith.constant 2 : index
    %c0_71 = arith.constant 0 : index
    %78 = tpu.strided_load %arg13[%c2_69, %c2_70, %c0_71] {strides = array<i32: 2, 2, 1>} : memref<18x18x4xf32, #tpu.memory_space<vmem>>, vector<8x8x4xf32>
    %79 = vector.shape_cast %78 : vector<8x8x4xf32> to vector<64x4xf32>
    %80 = arith.truncf %79 : vector<64x4xf32> to vector<64x4xbf16>
    %c8 = arith.constant 8 : index
    %c0_72 = arith.constant 0 : index
    %c0_73 = arith.constant 0 : index
    %81 = vector.load %arg6[%c8, %c0_72, %c0_73] : memref<9x4x4xbf16, #tpu.memory_space<vmem>>, vector<1x4x4xbf16>
    %82 = vector.shape_cast %81 : vector<1x4x4xbf16> to vector<4x4xbf16>
    %cst_74 = arith.constant dense<0.000000e+00> : vector<64x4xf32>
    %83 = tpu.matmul %80, %82, %cst_74 {dimension_numbers = #tpu.dot_dimension_numbers<[1], [0], [0], [1], [0, 0, 1, 1], [], []>} : vector<64x4xbf16>, vector<4x4xbf16>, vector<64x4xf32> -> vector<64x4xf32>
    %84 = arith.addf %77, %83 : vector<64x4xf32>
    %c0_75 = arith.constant 0 : index
    %c0_76 = arith.constant 0 : index
    %85 = vector.load %arg7[%c0_75, %c0_76] : memref<1x4xf32, #tpu.memory_space<vmem>>, vector<1x4xf32>
    %86 = vector.broadcast %85 : vector<1x4xf32> to vector<64x4xf32>
    %87 = arith.addf %84, %86 : vector<64x4xf32>
    %cst_77 = arith.constant 0.000000e+00 : f32
    %88 = vector.broadcast %cst_77 : f32 to vector<64x4xf32>
    %89 = arith.maximumf %87, %88 : vector<64x4xf32>
    %90 = arith.truncf %89 : vector<64x4xf32> to vector<64x4xbf16>
    %c0_78 = arith.constant 0 : index
    %c0_79 = arith.constant 0 : index
    %91 = vector.load %arg8[%c0_78, %c0_79] : memref<4x16xbf16, #tpu.memory_space<vmem>>, vector<4x16xbf16>
    %cst_80 = arith.constant dense<0.000000e+00> : vector<64x16xf32>
    %92 = tpu.matmul %90, %91, %cst_80 {dimension_numbers = #tpu.dot_dimension_numbers<[1], [0], [0], [1], [0, 0, 1, 1], [], []>} : vector<64x4xbf16>, vector<4x16xbf16>, vector<64x16xf32> -> vector<64x16xf32>
    %c0_81 = arith.constant 0 : index
    %c0_82 = arith.constant 0 : index
    %c0_83 = arith.constant 0 : index
    %c0_84 = arith.constant 0 : index
    %93 = tpu.strided_load %arg1[%c0_81, %c0_82, %c0_83, %c0_84] {strides = array<i32: 1, 2, 2, 1>} : memref<1x16x16x8xf32, #tpu.memory_space<vmem>>, vector<1x8x8x8xf32>
    %94 = vector.shape_cast %93 : vector<1x8x8x8xf32> to vector<8x8x8xf32>
    %95 = vector.shape_cast %94 : vector<8x8x8xf32> to vector<64x8xf32>
    %c0_85 = arith.constant 0 : index
    %c0_86 = arith.constant 0 : index
    %96 = vector.load %arg9[%c0_85, %c0_86] : memref<1x8xf32, #tpu.memory_space<vmem>>, vector<1x8xf32>
    %97 = vector.broadcast %96 : vector<1x8xf32> to vector<64x8xf32>
    %98 = arith.mulf %95, %97 : vector<64x8xf32>
    %c0_87 = arith.constant 0 : index
    %c0_88 = arith.constant 0 : index
    %99 = vector.load %arg10[%c0_87, %c0_88] : memref<1x8xf32, #tpu.memory_space<vmem>>, vector<1x8xf32>
    %100 = vector.broadcast %99 : vector<1x8xf32> to vector<64x8xf32>
    %101 = arith.addf %98, %100 : vector<64x8xf32>
    %cst_89 = arith.constant 0.000000e+00 : f32
    %102 = vector.broadcast %cst_89 : f32 to vector<64x8xf32>
    %103 = arith.maximumf %101, %102 : vector<64x8xf32>
    %104 = arith.truncf %103 : vector<64x8xf32> to vector<64x8xbf16>
    %c0_90 = arith.constant 0 : index
    %c0_91 = arith.constant 0 : index
    %105 = vector.load %arg11[%c0_90, %c0_91] : memref<8x16xbf16, #tpu.memory_space<vmem>>, vector<8x16xbf16>
    %cst_92 = arith.constant dense<0.000000e+00> : vector<64x16xf32>
    %106 = tpu.matmul %104, %105, %cst_92 {dimension_numbers = #tpu.dot_dimension_numbers<[1], [0], [0], [1], [0, 0, 1, 1], [], []>} : vector<64x8xbf16>, vector<8x16xbf16>, vector<64x16xf32> -> vector<64x16xf32>
    %107 = arith.addf %92, %106 : vector<64x16xf32>
    %c0_93 = arith.constant 0 : index
    %c0_94 = arith.constant 0 : index
    %c0_95 = arith.constant 0 : index
    %108 = vector.load %arg12[%c0_93, %c0_94, %c0_95] : memref<1x64x16xf32, #tpu.memory_space<vmem>>, vector<1x64x16xf32>
    %109 = vector.shape_cast %108 : vector<1x64x16xf32> to vector<64x16xf32>
    %110 = vector.shape_cast %107 : vector<64x16xf32> to vector<1x64x16xf32>
    tpu.vector_store %arg12[%c0_93, %c0_94, %c0_95], %110 {strides = array<i32>} : memref<1x64x16xf32, #tpu.memory_space<vmem>>, vector<1x64x16xf32>,
    return
  }
  func.func @transform_0(%arg0: i32) -> (i32, i32, i32, i32) {
    %c0_i32 = arith.constant 0 : i32
    %c0_i32_0 = arith.constant 0 : i32
    %c0_i32_1 = arith.constant 0 : i32
    %c0_i32_2 = arith.constant 0 : i32
    return %arg0, %c0_i32, %c0_i32_0, %c0_i32_1 : i32, i32, i32, i32
  }
  func.func @transform_1(%arg0: i32) -> (i32, i32) {
    %c0_i32 = arith.constant 0 : i32
    %c0_i32_0 = arith.constant 0 : i32
    %c0_i32_1 = arith.constant 0 : i32
    return %c0_i32, %c0_i32_0 : i32, i32
  }
  func.func @transform_2(%arg0: i32) -> (i32, i32) {
    %c0_i32 = arith.constant 0 : i32
    %c0_i32_0 = arith.constant 0 : i32
    %c0_i32_1 = arith.constant 0 : i32
    return %c0_i32, %c0_i32_0 : i32, i32
  }
  func.func @transform_3(%arg0: i32) -> (i32, i32) {
    %c0_i32 = arith.constant 0 : i32
    %c0_i32_0 = arith.constant 0 : i32
    %c0_i32_1 = arith.constant 0 : i32
    return %c0_i32, %c0_i32_0 : i32, i32
  }
  func.func @transform_4(%arg0: i32) -> (i32, i32) {
    %c0_i32 = arith.constant 0 : i32
    %c0_i32_0 = arith.constant 0 : i32
    %c0_i32_1 = arith.constant 0 : i32
    return %c0_i32, %c0_i32_0 : i32, i32
  }
  func.func @transform_5(%arg0: i32) -> (i32, i32, i32) {
    %c0_i32 = arith.constant 0 : i32
    %c0_i32_0 = arith.constant 0 : i32
    %c0_i32_1 = arith.constant 0 : i32
    %c0_i32_2 = arith.constant 0 : i32
    return %c0_i32, %c0_i32_0, %c0_i32_1 : i32, i32, i32
  }
  func.func @transform_6(%arg0: i32) -> (i32, i32) {
    %c0_i32 = arith.constant 0 : i32
    %c0_i32_0 = arith.constant 0 : i32
    %c0_i32_1 = arith.constant 0 : i32
    return %c0_i32, %c0_i32_0 : i32, i32
  }
  func.func @transform_7(%arg0: i32) -> (i32, i32) {
    %c0_i32 = arith.constant 0 : i32
    %c0_i32_0 = arith.constant 0 : i32
    %c0_i32_1 = arith.constant 0 : i32
    return %c0_i32, %c0_i32_0 : i32, i32
  }
  func.func @transform_8(%arg0: i32) -> (i32, i32) {
    %c0_i32 = arith.constant 0 : i32
    %c0_i32_0 = arith.constant 0 : i32
    %c0_i32_1 = arith.constant 0 : i32
    return %c0_i32, %c0_i32_0 : i32, i32
  }
  func.func @transform_9(%arg0: i32) -> (i32, i32) {
    %c0_i32 = arith.constant 0 : i32
    %c0_i32_0 = arith.constant 0 : i32
    %c0_i32_1 = arith.constant 0 : i32
    return %c0_i32, %c0_i32_0 : i32, i32
  }
  func.func @transform_10(%arg0: i32) -> (i32, i32) {
    %c0_i32 = arith.constant 0 : i32
    %c0_i32_0 = arith.constant 0 : i32
    %c0_i32_1 = arith.constant 0 : i32
    return %c0_i32, %c0_i32_0 : i32, i32
  }
  func.func @transform_11(%arg0: i32) -> (i32, i32, i32) {
    %c0_i32 = arith.constant 0 : i32
    %c0_i32_0 = arith.constant 0 : i32
    %c0_i32_1 = arith.constant 0 : i32
    return %arg0, %c0_i32, %c0_i32_0 : i32, i32, i32
  }
}

</mosaic_0001>

<bundles_post_ra>
// kernel: tpu_custom_call.1
= control target key start
LH: loop header
LB: loop body
LE: loop exit
PB: predicated region body
PF: predicated region fallthrough
CT: control target
= control target key end

     0   :  { %s2692_s17 = smov 0   ;;  %s3095_s0 = inlined_call_operand.vmem [shape: f32[2,16,16,8], index: 0, kind: input, shape index: {}]   ;;  %s3096_s1 = inlined_call_operand.vmem [shape: f32[1,8], index: 1, kind: input, shape index: {}]   ;;  %s3097_s2 = inlined_call_operand.vmem [shape: f32[1,8], index: 2, kind: input, shape index: {}]   ;;  %s3098_s3 = inlined_call_operand.vmem [shape: bf16[8,4], index: 3, kind: input, shape index: {}]   ;;  %s3099_s4 = inlined_call_operand.vmem [shape: f32[1,4], index: 4, kind: input, shape index: {}]   ;;  %s3100_s5 = inlined_call_operand.vmem [shape: bf16[9,4,4], index: 5, kind: input, shape index: {}]   ;;  %s3101_s6 = inlined_call_operand.vmem [shape: f32[1,4], index: 6, kind: input, shape index: {}]   ;;  %s3102_s7 = inlined_call_operand.vmem [shape: bf16[4,16], index: 7, kind: input, shape index: {}]   ;;  %s3103_s8 = inlined_call_operand.vmem [shape: f32[1,8], index: 8, kind: input, shape index: {}]   ;;  %s3104_s9 = inlined_call_operand.vmem [shape: f32[1,8], index: 9, kind: input, shape index: {}]   ;;  %s3105_s10 = inlined_call_operand.vmem [shape: bf16[8,16], index: 10, kind: input, shape index: {}]   ;;  %s3106_s11 = inlined_call_operand.vmem [shape: f32[2,64,16], index: 11, kind: output, shape index: {}]  }
   0x1 LB: > { %s2217_s18 = sadd.s32 4294967295, %s2629_s17   ;;  %p2221_p0 = scmp.ge.s32.totalorder %s2629_s17, 1  ;;  %s2629_s17 = sphi %s2692_s17, %s21_s17  }
   0x2   : > { %p337_p1 = scmp.lt.s32.totalorder %s2629_s17, 3 }
   0x4   : > { %p338_p2 = pnand %p2221_p0, %p337_p1 }
   0x5   : > { %v546_v0 = vld [vmem:[%s3098_s3] sm:$0xf] (!%p338_p2)  ;;  %vm603_vm0 = vcmask (!%p338_p2), 1043456   ;;  %p377_p3 = scmp.lt.s32.totalorder (!%p338_p2), %s2217_s18, 1  ;;  %vm554_vm1 = vcmask (!%p338_p2), 64512   ;;  %vm800_vm2 = vcmask (!%p338_p2), 31744  }
   0x6   : > { %341 = sbr.rel (%p338_p2) target bundleno = 854 (0x356), region = 64  ;;  %2601 = vmatprep.subr.msk.bf16.mxu0 (!%p338_p2), %vm603_vm0, %v546_v0  ;;  %v605_v1 = vsel (!%p338_p2), %vm603_vm0, %v546_v0, 0  ;;  %v2711_v2 = vld [vmem:[%s3096_s1] ss:$0 sm:$0xff] (!%p338_p2)  ;;  %vm803_vm3 = vcmask (!%p338_p2), 25600   ;;  %vm943_vm4 = vcmask (!%p338_p2), 1041408  }
   0x7   : > { %2384 = vmatpush3.bf16.msra.mxu0 (!%p338_p2), %v605_v1  ;;  %v2721_v3 = vld [vmem:[%s3097_s2] ss:$0 sm:$0xff] (!%p338_p2)  ;;  %vm2107_vm5 = vcmask (!%p338_p2), 130048  }
   0xd   : > { %s3108_s18 = smov (!%p377_p3, %s2217_s18), 1 }
   0xe   : > { %s2309_s21 = sshll.u32 %s3108_s18, 8  ;;  %s2310_s25 = sshll.u32 %s3108_s18, 6 }
   0xf   : > { %s2716_s26 = scalar_lea.vmem %s3095_s0, %s2309_s21  ;;  %s386_s29 = scalar_lea.vmem %s3106_s11, %s2310_s25 }
  0x10   : > { %v388_v4 = vld [vmem:[%s2716_s26] sm:$0xff]  ;;  %v389_v5 = vld [vmem:[%s2716_s26 + $0x8] sm:$0xff]  ;;  %v390_v6 = vld [vmem:[%s2716_s26 + $0x10] sm:$0xff] }
  0x11   : > { %v427_v7 = vmul.f32 %v2711_v2, %v388_v4  ;;  %v428_v8 = vmul.f32 %v2711_v2, %v389_v5  ;;  %v391_v9 = vld [vmem:[%s2716_s26 + $0x18] sm:$0xff]  ;;  %v429_v10 = vmul.f32 %v2711_v2, %v390_v6  ;;  %v392_v11 = vld [vmem:[%s2716_s26 + $0x20] sm:$0xff]  ;;  %v393_v12 = vld [vmem:[%s2716_s26 + $0x28] sm:$0xff] }
  0x12   : > { %v430_v13 = vmul.f32 %v2711_v2, %v391_v9  ;;  %v431_v14 = vmul.f32 %v2711_v2, %v392_v11  ;;  %v432_v15 = vmul.f32 %v2711_v2, %v393_v12  ;;  %v394_v16 = vld [vmem:[%s2716_s26 + $0x30] sm:$0xff]  ;;  %v395_v17 = vld [vmem:[%s2716_s26 + $0x38] sm:$0xff]  ;;  %v396_v26 = vld [vmem:[%s2716_s26 + $0x40] sm:$0xff] }
  0x13   : > { %v466_v18 = vadd.f32 %v2721_v3, %v427_v7  ;;  %v467_v19 = vadd.f32 %v2721_v3, %v428_v8  ;;  %v468_v20 = vadd.f32 %v2721_v3, %v429_v10  ;;  %v433_v21 = vmul.f32 %v2711_v2, %v394_v16  ;;  %v397_v27 = vld [vmem:[%s2716_s26 + $0x48] sm:$0xff]  ;;  %v398_v39 = vld [vmem:[%s2716_s26 + $0x50] sm:$0xff]  ;;  %v399_v40 = vld [vmem:[%s2716_s26 + $0x58] sm:$0xff] }
  0x14   : > { %v469_v22 = vadd.f32 %v2721_v3, %v430_v13  ;;  %v470_v23 = vadd.f32 %v2721_v3, %v431_v14  ;;  %v471_v24 = vadd.f32 %v2721_v3, %v432_v15  ;;  %v434_v25 = vmul.f32 %v2711_v2, %v395_v17  ;;  %v400_v43 = vld [vmem:[%s2716_s26 + $0x60] sm:$0xff]  ;;  %v401_v44 = vld [vmem:[%s2716_s26 + $0x68] sm:$0xff]  ;;  %v402_v61 = vld [vmem:[%s2716_s26 + $0x70] sm:$0xff] }
  0x15   : > { %v498_v28 = vmax.f32 %v466_v18, 0.0  ;;  %v499_v29 = vmax.f32 %v467_v19, 0.0  ;;  %v500_v30 = vmax.f32 %v468_v20, 0.0  ;;  %v472_v31 = vadd.f32 %v2721_v3, %v433_v21  ;;  %v403_v62 = vld [vmem:[%s2716_s26 + $0x78] sm:$0xff]  ;;  %v404_v63 = vld [vmem:[%s2716_s26 + $0x80] sm:$0xff]  ;;  %v405_v0 = vld [vmem:[%s2716_s26 + $0x88] sm:$0xff] }
  0x16   : > { %v501_v32 = vmax.f32 %v469_v22, 0.0  ;;  %v502_v33 = vmax.f32 %v470_v23, 0.0  ;;  %v503_v34 = vmax.f32 %v471_v24, 0.0  ;;  %v473_v35 = vadd.f32 %v2721_v3, %v434_v25  ;;  %v406_v17 = vld [vmem:[%s2716_s26 + $0x90] sm:$0xff]  ;;  %v407_v18 = vld [vmem:[%s2716_s26 + $0x98] sm:$0xff]  ;;  %v408_v19 = vld [vmem:[%s2716_s26 + $0xa0] sm:$0xff] }
  0x17   : > { %v530_v36 = vpack.c.bf16 %v499_v29, %v498_v28  ;;  %v435_v37 = vmul.f32 %v2711_v2, %v396_v26  ;;  %v436_v38 = vmul.f32 %v2711_v2, %v397_v27  ;;  %v504_v47 = vmax.f32 %v472_v31, 0.0  ;;  %v409_v20 = vld [vmem:[%s2716_s26 + $0xa8] sm:$0xff] }
  0x18   : > { %v531_v41 = vpack.c.bf16 %v501_v32, %v500_v30  ;;  %v532_v42 = vpack.c.bf16 %v503_v34, %v502_v33  ;;  %v505_v48 = vmax.f32 %v473_v35, 0.0  ;;  %v437_v49 = vmul.f32 %v2711_v2, %v398_v39  ;;  %v410_v35 = vld [vmem:[%s2716_s26 + $0xb0] sm:$0xff] }
  0x19   : > { %2385 = vmatprep.mubr.msk.bf16.mxu0 %vm554_vm1, %v530_v36  ;;  %v474_v45 = vadd.f32 %v2721_v3, %v435_v37  ;;  %v475_v46 = vadd.f32 %v2721_v3, %v436_v38  ;;  %v438_v50 = vmul.f32 %v2711_v2, %v399_v40  ;;  %v439_v53 = vmul.f32 %v2711_v2, %v400_v43  ;;  %v411_v36 = vld [vmem:[%s2716_s26 + $0xb8] sm:$0xff]  ;;  %v412_v37 = vld [vmem:[%s2716_s26 + $0xc0] sm:$0xff]  ;;  %v413_v38 = vld [vmem:[%s2716_s26 + $0xc8] sm:$0xff] }
  0x1a   : > { %2386 = vmatmul.mubr.msk.bf16.vlgmr.msra.gmra.mrb[0].mxu0 %vm554_vm1, %v531_v41  ;;  %v440_v54 = vmul.f32 %v2711_v2, %v401_v44  ;;  %v533_v55 = vpack.c.bf16 %v505_v48, %v504_v47  ;;  %v476_v56 = vadd.f32 %v2721_v3, %v437_v49  ;;  %v441_v5 = vmul.f32 %v2711_v2, %v402_v61 }
  0x1b   : > { %2389 = vmatprep.mubr.msk.bf16.mxu0 %vm554_vm1, %v532_v42  ;;  %v506_v51 = vmax.f32 %v474_v45, 0.0  ;;  %v507_v52 = vmax.f32 %v475_v46, 0.0  ;;  %v477_v57 = vadd.f32 %v2721_v3, %v438_v50  ;;  %v478_v59 = vadd.f32 %v2721_v3, %v439_v53  ;;  %v414_v53 = vld [vmem:[%s2716_s26 + $0xd0] sm:$0xff] }
  0x1c   : > { %v479_v60 = vadd.f32 %v2721_v3, %v440_v54  ;;  %v508_v1 = vmax.f32 %v476_v56, 0.0  ;;  %v442_v6 = vmul.f32 %v2711_v2, %v403_v62  ;;  %v443_v9 = vmul.f32 %v2711_v2, %v404_v63  ;;  %v415_v54 = vld [vmem:[%s2716_s26 + $0xd8] sm:$0xff]  ;;  %v417_v56 = vld [vmem:[%s2716_s26 + $0xe8] sm:$0xff] }
  0x1d   : > { %v534_v58 = vpack.c.bf16 %v507_v52, %v506_v51  ;;  %v509_v4 = vmax.f32 %v477_v57, 0.0  ;;  %v510_v7 = vmax.f32 %v478_v59, 0.0  ;;  %v444_v10 = vmul.f32 %v2711_v2, %v405_v0 }
  0x1e   : > { %v511_v8 = vmax.f32 %v479_v60, 0.0  ;;  %v480_v12 = vadd.f32 %v2721_v3, %v441_v5  ;;  %v481_v13 = vadd.f32 %v2721_v3, %v442_v6  ;;  %v482_v15 = vadd.f32 %v2721_v3, %v443_v9  ;;  %v418_v9 = vld [vmem:[%s2716_s26 + $0xf0] sm:$0xff] }
  0x1f   : > { %v535_v11 = vpack.c.bf16 %v509_v4, %v508_v1  ;;  %v483_v16 = vadd.f32 %v2721_v3, %v444_v10  ;;  %v445_v23 = vmul.f32 %v2711_v2, %v406_v17  ;;  %v446_v24 = vmul.f32 %v2711_v2, %v407_v18  ;;  %v419_v10 = vld [vmem:[%s2716_s26 + $0xf8] sm:$0xff] }
  0x20   : > { %v536_v14 = vpack.c.bf16 %v511_v8, %v510_v7  ;;  %v512_v21 = vmax.f32 %v480_v12, 0.0  ;;  %v513_v22 = vmax.f32 %v481_v13, 0.0  ;;  %v514_v25 = vmax.f32 %v482_v15, 0.0 }
  0x21   : > { %v515_v26 = vmax.f32 %v483_v16, 0.0  ;;  %v447_v27 = vmul.f32 %v2711_v2, %v408_v19  ;;  %v448_v28 = vmul.f32 %v2711_v2, %v409_v20  ;;  %v484_v30 = vadd.f32 %v2721_v3, %v445_v23 }
  0x22   : > { %2390 = vmatmul.mubr.msk.bf16.gmra.mrb[4].mxu0 %vm554_vm1, %v533_v55  ;;  %v537_v29 = vpack.c.bf16 %v513_v22, %v512_v21  ;;  %v485_v31 = vadd.f32 %v2721_v3, %v446_v24  ;;  %v449_v41 = vmul.f32 %v2711_v2, %v410_v35  ;;  %v450_v42 = vmul.f32 %v2711_v2, %v411_v36  ;;  %v416_v55 = vld [vmem:[%s2716_s26 + $0xe0] sm:$0xff] }
  0x23   : > { %2393 = vmatprep.mubr.msk.bf16.mxu0 %vm554_vm1, %v534_v58  ;;  %v538_v32 = vpack.c.bf16 %v515_v26, %v514_v25  ;;  %v486_v33 = vadd.f32 %v2721_v3, %v447_v27  ;;  %v487_v34 = vadd.f32 %v2721_v3, %v448_v28  ;;  %v516_v39 = vmax.f32 %v484_v30, 0.0  ;;  %v908_v25 = vld [vmem:[%s3100_s5] sm:$0x3]  ;;  %v2903_v27 = vld [vmem:[%s3100_s5 + $0x4] sm:$0x3] }
  0x24   : > { %v517_v40 = vmax.f32 %v485_v31, 0.0  ;;  %v451_v45 = vmul.f32 %v2711_v2, %v412_v37  ;;  %v452_v46 = vmul.f32 %v2711_v2, %v413_v38  ;;  %v488_v48 = vadd.f32 %v2721_v3, %v449_v41  ;;  %2604 = vmatprep.subr.msk.bf16.mxu1 %vm943_vm4, %v908_v25  ;;  %v2910_v28 = vld [vmem:[%s3099_s4] ss:$0 sm:$0xff] }
  0x25   : > { %v518_v43 = vmax.f32 %v486_v33, 0.0  ;;  %v519_v44 = vmax.f32 %v487_v34, 0.0  ;;  %v489_v49 = vadd.f32 %v2721_v3, %v450_v42  ;;  %v453_v59 = vmul.f32 %v2711_v2, %v414_v53 }
  0x26   : > { %v539_v47 = vpack.c.bf16 %v517_v40, %v516_v39  ;;  %v490_v51 = vadd.f32 %v2721_v3, %v451_v45  ;;  %v491_v52 = vadd.f32 %v2721_v3, %v452_v46  ;;  %v520_v57 = vmax.f32 %v488_v48, 0.0 }
  0x27   : > { %v540_v50 = vpack.c.bf16 %v519_v44, %v518_v43  ;;  %v521_v58 = vmax.f32 %v489_v49, 0.0  ;;  %v454_v60 = vmul.f32 %v2711_v2, %v415_v54  ;;  %v455_v63 = vmul.f32 %v2711_v2, %v416_v55 }
  0x28   : > { %v522_v61 = vmax.f32 %v490_v51, 0.0  ;;  %v523_v62 = vmax.f32 %v491_v52, 0.0  ;;  %v456_v0 = vmul.f32 %v2711_v2, %v417_v56  ;;  %v492_v4 = vadd.f32 %v2721_v3, %v453_v59 }
  0x29   : > { %v541_v1 = vpack.c.bf16 %v521_v58, %v520_v57  ;;  %v493_v5 = vadd.f32 %v2721_v3, %v454_v60  ;;  %v494_v7 = vadd.f32 %v2721_v3, %v455_v63  ;;  %v457_v13 = vmul.f32 %v2711_v2, %v418_v9 }
  0x2a   : > { %2394 = vmatmul.mubr.msk.bf16.gmra.mrb[8].mxu0 %vm554_vm1, %v535_v11  ;;  %v542_v6 = vpack.c.bf16 %v523_v62, %v522_v61  ;;  %v495_v8 = vadd.f32 %v2721_v3, %v456_v0  ;;  %v524_v11 = vmax.f32 %v492_v4, 0.0  ;;  %v2896_v26 = vsel %vm943_vm4, %v908_v25, 0 }
  0x2b   : > { %2397 = vmatprep.mubr.msk.bf16.mxu0 %vm554_vm1, %v536_v14  ;;  %v525_v12 = vmax.f32 %v493_v5, 0.0  ;;  %v458_v14 = vmul.f32 %v2711_v2, %v419_v10  ;;  %v526_v15 = vmax.f32 %v494_v7, 0.0  ;;  %v496_v18 = vadd.f32 %v2721_v3, %v457_v13  ;;  %2528 = vmatpush3.bf16.msra.mxu1 %v2896_v26 }
  0x2c   : > { %v527_v16 = vmax.f32 %v495_v8, 0.0  ;;  %v2631_v2 = vmov 0.0   ;;  %2605 = vmatprep.subr.msk.bf16.mxu1 %vm943_vm4, %v2903_v27 }
  0x2d   : > { %v543_v17 = vpack.c.bf16 %v525_v12, %v524_v11  ;;  %v497_v19 = vadd.f32 %v2721_v3, %v458_v14  ;;  %v528_v21 = vmax.f32 %v496_v18, 0.0  ;;  %808 = vst.msk [vmem:[#allocation2 + $0x30] sm:$0xff] %vm800_vm2, %v2631_v2  ;;  %809 = vst.msk [vmem:[#allocation2 + $0x38] sm:$0xff] %vm800_vm2, %v2631_v2  ;;  %v2245_v3 = vld [vmem:[%s3100_s5 + $0x2] sm:$0x3] }
  0x2e   : > { %v544_v20 = vpack.c.bf16 %v527_v16, %v526_v15  ;;  %801 = vst.msk [vmem:[#allocation2] sm:$0xff] %vm800_vm2, %v2631_v2  ;;  %802 = vst.msk [vmem:[#allocation2 + $0x8] sm:$0xff] %vm800_vm2, %v2631_v2  ;;  %2602 = vmatprep.subr.msk.bf16.mxu0 %vm943_vm4, %v2245_v3  ;;  %v945_v24 = vsel %vm943_vm4, %v2245_v3, 0 }
  0x2f   : > { %v529_v22 = vmax.f32 %v497_v19, 0.0  ;;  %805 = vst.msk [vmem:[#allocation2 + $0x18] sm:$0xff] %vm800_vm2, %v2631_v2  ;;  %806 = vst.msk [vmem:[#allocation2 + $0x20] sm:$0xff] %vm800_vm2, %v2631_v2  ;;  %2418 = vmatpush3.bf16.msra.mxu0 %v945_v24 }
  0x30   : > { %811 = vst.msk [vmem:[#allocation2 + $0x48] sm:$0xff] %vm800_vm2, %v2631_v2  ;;  %812 = vst.msk [vmem:[#allocation2 + $0x50] sm:$0xff] %vm800_vm2, %v2631_v2  ;;  %2603 = vmatprep.subr.msk.bf16.mxu0 %vm943_vm4, %v908_v25 }
  0x31   : > { %v545_v23 = vpack.c.bf16 %v529_v22, %v528_v21  ;;  %814 = vst.msk [vmem:[#allocation2 + $0x60] sm:$0xff] %vm800_vm2, %v2631_v2  ;;  %815 = vst.msk [vmem:[#allocation2 + $0x68] sm:$0xff] %vm800_vm2, %v2631_v2 }
  0x32   : > { %2398 = vmatmul.mubr.msk.bf16.gmra.mrb[12].mxu0 %vm554_vm1, %v537_v29  ;;  %817 = vst.msk [vmem:[#allocation2 + $0x78] sm:$0xff] %vm800_vm2, %v2631_v2  ;;  %818 = vst.msk [vmem:[#allocation2 + $0x80] sm:$0xff] %vm800_vm2, %v2631_v2 }
  0x33   : > { %2401 = vmatprep.mubr.msk.bf16.mxu0 %vm554_vm1, %v538_v32  ;;  %820 = vst.msk [vmem:[#allocation2 + $0x90] sm:$0xff] %vm800_vm2, %v2631_v2  ;;  %821 = vst.msk [vmem:[#allocation2 + $0x98] sm:$0xff] %vm800_vm2, %v2631_v2 }
  0x34   : > { %823 = vst.msk [vmem:[#allocation2 + $0xa8] sm:$0xff] %vm800_vm2, %v2631_v2  ;;  %824 = vst.msk [vmem:[#allocation2 + $0xb0] sm:$0xff] %vm800_vm2, %v2631_v2 }
  0x35   : > { %826 = vst.msk [vmem:[#allocation2 + $0xc0] sm:$0xff] %vm800_vm2, %v2631_v2  ;;  %827 = vst.msk [vmem:[#allocation2 + $0xc8] sm:$0xff] %vm800_vm2, %v2631_v2  ;;  %v910_v51 = vld [vmem:[#allocation2 + $0x1] ss:$2 sm:$0xff] }
  0x36   : > { %829 = vst.msk [vmem:[#allocation2 + $0xd8] sm:$0xff] %vm800_vm2, %v2631_v2  ;;  %830 = vst.msk [vmem:[#allocation2 + $0xe0] sm:$0xff] %vm800_vm2, %v2631_v2 }
  0x37   : > { %832 = vst.msk [vmem:[#allocation2 + $0xf0] sm:$0xff] %vm800_vm2, %v2631_v2  ;;  %833 = vst.msk [vmem:[#allocation2 + $0xf8] sm:$0xff] %vm800_vm2, %v2631_v2 }
  0x38   : > { %835 = vst.msk [vmem:[#allocation2 + $0x108] sm:$0xff] %vm800_vm2, %v2631_v2  ;;  %836 = vst.msk [vmem:[#allocation2 + $0x110] sm:$0xff] %vm800_vm2, %v2631_v2 }
  0x39   : > { %838 = vst.msk [vmem:[#allocation2 + $0x120] sm:$0xff] %vm800_vm2, %v2631_v2  ;;  %839 = vst.msk [vmem:[#allocation2 + $0x128] sm:$0xff] %vm800_vm2, %v2631_v2 }
  0x3a   : > { %2402 = vmatmul.mubr.msk.bf16.gmra.mrb[16].mxu0 %vm554_vm1, %v539_v47  ;;  %841 = vst.msk [vmem:[#allocation2 + $0x138] sm:$0xff] %vm800_vm2, %v2631_v2  ;;  %842 = vst.msk [vmem:[#allocation2 + $0x140] sm:$0xff] %vm800_vm2, %v2631_v2 }
  0x3b   : > { %2405 = vmatprep.mubr.msk.bf16.mxu0 %vm554_vm1, %v540_v50  ;;  %844 = vst.msk [vmem:[#allocation2 + $0x150] sm:$0xff] %vm800_vm2, %v2631_v2  ;;  %845 = vst.msk [vmem:[#allocation2 + $0x158] sm:$0xff] %vm800_vm2, %v2631_v2 }
  0x3c   : > { %847 = vst.msk [vmem:[#allocation2 + $0x168] sm:$0xff] %vm800_vm2, %v2631_v2  ;;  %848 = vst.msk [vmem:[#allocation2 + $0x170] sm:$0xff] %vm800_vm2, %v2631_v2 }
  0x3d   : > { %850 = vst.msk [vmem:[#allocation2 + $0x180] sm:$0xff] %vm800_vm2, %v2631_v2  ;;  %851 = vst.msk [vmem:[#allocation2 + $0x188] sm:$0xff] %vm800_vm2, %v2631_v2 }
  0x3e   : > { %810 = vst.msk [vmem:[#allocation2 + $0x40] sm:$0x3] %vm803_vm3, %v2631_v2  ;;  %804 = vst.msk [vmem:[#allocation2 + $0x10] sm:$0x3] %vm803_vm3, %v2631_v2 }
  0x3f   : > { %807 = vst.msk [vmem:[#allocation2 + $0x28] sm:$0x3] %vm803_vm3, %v2631_v2  ;;  %813 = vst.msk [vmem:[#allocation2 + $0x58] sm:$0x3] %vm803_vm3, %v2631_v2 }
  0x40   : > { %816 = vst.msk [vmem:[#allocation2 + $0x70] sm:$0x3] %vm803_vm3, %v2631_v2  ;;  %819 = vst.msk [vmem:[#allocation2 + $0x88] sm:$0x3] %vm803_vm3, %v2631_v2 }
  0x41   : > { %822 = vst.msk [vmem:[#allocation2 + $0xa0] sm:$0x3] %vm803_vm3, %v2631_v2  ;;  %825 = vst.msk [vmem:[#allocation2 + $0xb8] sm:$0x3] %vm803_vm3, %v2631_v2 }
  0x42   : > { %2406 = vmatmul.mubr.msk.bf16.gmra.mrb[20].mxu0 %vm554_vm1, %v541_v1  ;;  %828 = vst.msk [vmem:[#allocation2 + $0xd0] sm:$0x3] %vm803_vm3, %v2631_v2  ;;  %831 = vst.msk [vmem:[#allocation2 + $0xe8] sm:$0x3] %vm803_vm3, %v2631_v2 }
  0x43   : > { %2409 = vmatprep.mubr.msk.bf16.mxu0 %vm554_vm1, %v542_v6  ;;  %834 = vst.msk [vmem:[#allocation2 + $0x100] sm:$0x3] %vm803_vm3, %v2631_v2  ;;  %837 = vst.msk [vmem:[#allocation2 + $0x118] sm:$0x3] %vm803_vm3, %v2631_v2 }
  0x44   : > { %840 = vst.msk [vmem:[#allocation2 + $0x130] sm:$0x3] %vm803_vm3, %v2631_v2  ;;  %843 = vst.msk [vmem:[#allocation2 + $0x148] sm:$0x3] %vm803_vm3, %v2631_v2 }
  0x45   : > { %846 = vst.msk [vmem:[#allocation2 + $0x160] sm:$0x3] %vm803_vm3, %v2631_v2  ;;  %849 = vst.msk [vmem:[#allocation2 + $0x178] sm:$0x3] %vm803_vm3, %v2631_v2 }
  0x46   : > { %852 = vst.msk [vmem:[#allocation2 + $0x190] sm:$0x3] %vm803_vm3, %v2631_v2 }
  0x4a   : > { %2410 = vmatmul.mubr.msk.bf16.gmra.mrb[24].mxu0 %vm554_vm1, %v543_v17 }
  0x4b   : > { %2413 = vmatprep.mubr.msk.bf16.mxu0 %vm554_vm1, %v544_v20 }
  0x52   : > { %2414 = vmatmul.mubr.msk.bf16.gmra.mrb[28].mxu0 %vm554_vm1, %v545_v23 }
  0xed   : > { %v2387_v29 = vpop.f32.mrb[0].mxu0 }
  0xee   : > { %v650_v30 = vadd.f32 %v2387_v29, %v2910_v28  ;;  %v641_v31 = vpop.f32.mrb[1].mxu0 }
  0xef   : > { %v642_v32 = vadd.f32 %v2910_v28, %v641_v31  ;;  %v2388_v33 = vpop.f32.mrb[2].mxu0 }
  0xf0   : > { %v770_v34 = vmax.f32 %v650_v30, 0.0  ;;  %v653_v35 = vadd.f32 %v2388_v33, %v2910_v28  ;;  %v644_v36 = vpop.f32.mrb[3].mxu0 }
  0xf1   : > { %v768_v37 = vmax.f32 %v642_v32, 0.0  ;;  %v645_v38 = vadd.f32 %v2910_v28, %v644_v36 }
  0xf2   : > { %859 = vst.msk [vmem:[#allocation2 + $0x31] sm:$0xff] %vm800_vm2, %v770_v34  ;;  %v771_v39 = vmax.f32 %v653_v35, 0.0 }
  0xf3   : > { %857 = vst.msk [vmem:[#allocation2 + $0x19] sm:$0xff] %vm800_vm2, %v768_v37  ;;  %v769_v40 = vmax.f32 %v645_v38, 0.0 }
  0xf4   : > { %860 = vst.msk [vmem:[#allocation2 + $0x39] sm:$0xff] %vm800_vm2, %v771_v39 }
  0xf5   : > { %858 = vst.msk [vmem:[#allocation2 + $0x21] sm:$0xff] %vm800_vm2, %v769_v40  ;;  %v2391_v41 = vpop.f32.mrb[4].mxu0 }
  0xf6   : > { %v666_v42 = vadd.f32 %v2391_v41, %v2910_v28  ;;  %v657_v43 = vpop.f32.mrb[5].mxu0 }
  0xf7   : > { %v658_v44 = vadd.f32 %v2910_v28, %v657_v43  ;;  %v2392_v45 = vpop.f32.mrb[6].mxu0 }
  0xf8   : > { %v774_v46 = vmax.f32 %v666_v42, 0.0  ;;  %v669_v47 = vadd.f32 %v2392_v45, %v2910_v28  ;;  %v660_v48 = vpop.f32.mrb[7].mxu0 }
  0xf9   : > { %v772_v49 = vmax.f32 %v658_v44, 0.0  ;;  %v661_v50 = vadd.f32 %v2910_v28, %v660_v48 }
  0xfa   : > { %863 = vst.msk [vmem:[#allocation2 + $0x61] sm:$0xff] %vm800_vm2, %v774_v46  ;;  %v775_v52 = vmax.f32 %v669_v47, 0.0 }
  0xfb   : > { %861 = vst.msk [vmem:[#allocation2 + $0x49] sm:$0xff] %vm800_vm2, %v772_v49  ;;  %v773_v53 = vmax.f32 %v661_v50, 0.0  ;;  %v912_v54 = vld [vmem:[#allocation2 + $0x31] ss:$2 sm:$0xff] }
  0xfc   : > { %864 = vst.msk [vmem:[#allocation2 + $0x69] sm:$0xff] %vm800_vm2, %v775_v52  ;;  %v925_v55 = vpack.c.bf16 %v912_v54, %v910_v51 }
  0xfd   : > { %862 = vst.msk [vmem:[#allocation2 + $0x51] sm:$0xff] %vm800_vm2, %v773_v53  ;;  %v2395_v56 = vpop.f32.mrb[8].mxu0 }
  0xfe   : > { %v682_v57 = vadd.f32 %v2395_v56, %v2910_v28  ;;  %v673_v58 = vpop.f32.mrb[9].mxu0  ;;  %2419 = vmatprep.mubr.msk.bf16.mxu0 %vm800_vm2, %v925_v55 }
  0xff   : > { %v674_v59 = vadd.f32 %v2910_v28, %v673_v58  ;;  %v2396_v60 = vpop.f32.mrb[10].mxu0 }
 0x100   : > { %v778_v61 = vmax.f32 %v682_v57, 0.0  ;;  %v685_v62 = vadd.f32 %v2396_v60, %v2910_v28  ;;  %v676_v63 = vpop.f32.mrb[11].mxu0 }
 0x101   : > { %v776_v0 = vmax.f32 %v674_v59, 0.0  ;;  %v677_v1 = vadd.f32 %v2910_v28, %v676_v63 }
 0x102   : > { %867 = vst.msk [vmem:[#allocation2 + $0x91] sm:$0xff] %vm800_vm2, %v778_v61  ;;  %v779_v4 = vmax.f32 %v685_v62, 0.0 }
 0x103   : > { %865 = vst.msk [vmem:[#allocation2 + $0x79] sm:$0xff] %vm800_vm2, %v776_v0  ;;  %v777_v5 = vmax.f32 %v677_v1, 0.0  ;;  %v914_v18 = vld [vmem:[#allocation2 + $0x61] ss:$2 sm:$0xff] }
 0x104   : > { %868 = vst.msk [vmem:[#allocation2 + $0x99] sm:$0xff] %vm800_vm2, %v779_v4 }
 0x105   : > { %866 = vst.msk [vmem:[#allocation2 + $0x81] sm:$0xff] %vm800_vm2, %v777_v5  ;;  %v2399_v6 = vpop.f32.mrb[12].mxu0 }
 0x106   : > { %v698_v7 = vadd.f32 %v2399_v6, %v2910_v28  ;;  %v689_v8 = vpop.f32.mrb[13].mxu0 }
 0x107   : > { %v690_v9 = vadd.f32 %v2910_v28, %v689_v8  ;;  %v2400_v10 = vpop.f32.mrb[14].mxu0 }
 0x108   : > { %v782_v11 = vmax.f32 %v698_v7, 0.0  ;;  %v701_v12 = vadd.f32 %v2400_v10, %v2910_v28  ;;  %v692_v13 = vpop.f32.mrb[15].mxu0 }
 0x109   : > { %v780_v14 = vmax.f32 %v690_v9, 0.0  ;;  %v693_v15 = vadd.f32 %v2910_v28, %v692_v13  ;;  %v889_v9 = vld [vmem:[#allocation2] ss:$2 sm:$0xff] }
 0x10a   : > { %871 = vst.msk [vmem:[#allocation2 + $0xc1] sm:$0xff] %vm800_vm2, %v782_v11  ;;  %v783_v16 = vmax.f32 %v701_v12, 0.0  ;;  %v891_v12 = vld [vmem:[#allocation2 + $0x30] ss:$2 sm:$0xff] }
 0x10b   : > { %869 = vst.msk [vmem:[#allocation2 + $0xa9] sm:$0xff] %vm800_vm2, %v780_v14  ;;  %v781_v17 = vmax.f32 %v693_v15, 0.0  ;;  %v916_v19 = vld [vmem:[#allocation2 + $0x91] ss:$2 sm:$0xff]  ;;  %v1093_v13 = vld [vmem:[#allocation2 + $0x2] ss:$2 sm:$0xff] }
 0x10c   : > { %872 = vst.msk [vmem:[#allocation2 + $0xc9] sm:$0xff] %vm800_vm2, %v783_v16  ;;  %v926_v20 = vpack.c.bf16 %v916_v19, %v914_v18  ;;  %v1095_v14 = vld [vmem:[#allocation2 + $0x32] ss:$2 sm:$0xff] }
 0x10d   : > { %870 = vst.msk [vmem:[#allocation2 + $0xb1] sm:$0xff] %vm800_vm2, %v781_v17  ;;  %v2403_v21 = vpop.f32.mrb[16].mxu0 }
 0x10e   : > { %v714_v22 = vadd.f32 %v2403_v21, %v2910_v28  ;;  %v705_v23 = vpop.f32.mrb[17].mxu0  ;;  %2420 = vmatmul.mubr.msk.bf16.vlgmr.msra.gmra.mrb[32].mxu0 %vm800_vm2, %v926_v20 }
 0x10f   : > { %v706_v2 = vadd.f32 %v2910_v28, %v705_v23  ;;  %v2404_v3 = vpop.f32.mrb[18].mxu0  ;;  %2428 = vmatpush3.bf16.msra.mxu0 %v2896_v26  ;;  %v904_v23 = vpack.c.bf16 %v891_v12, %v889_v9 }
 0x110   : > { %v786_v24 = vmax.f32 %v714_v22, 0.0  ;;  %v717_v25 = vadd.f32 %v2404_v3, %v2910_v28  ;;  %v708_v29 = vpop.f32.mrb[19].mxu0  ;;  %v1108_v3 = vpack.c.bf16 %v1095_v14, %v1093_v13 }
 0x111   : > { %v784_v30 = vmax.f32 %v706_v2, 0.0  ;;  %v709_v31 = vadd.f32 %v2910_v28, %v708_v29  ;;  %v2259_v2 = vld [vmem:[%s3100_s5 + $0x6] sm:$0x3] }
 0x112   : > { %875 = vst.msk [vmem:[#allocation2 + $0xf1] sm:$0xff] %vm800_vm2, %v786_v24  ;;  %v787_v32 = vmax.f32 %v717_v25, 0.0  ;;  %v1099_v24 = vld [vmem:[#allocation2 + $0x92] ss:$2 sm:$0xff] }
 0x113   : > { %873 = vst.msk [vmem:[#allocation2 + $0xd9] sm:$0xff] %vm800_vm2, %v784_v30  ;;  %v785_v33 = vmax.f32 %v709_v31, 0.0  ;;  %v918_v44 = vld [vmem:[#allocation2 + $0xc1] ss:$2 sm:$0xff]  ;;  %v897_v45 = vld [vmem:[#allocation2 + $0xc0] ss:$2 sm:$0xff] }
 0x114   : > { %876 = vst.msk [vmem:[#allocation2 + $0xf9] sm:$0xff] %vm800_vm2, %v787_v32  ;;  %v893_v29 = vld [vmem:[#allocation2 + $0x60] ss:$2 sm:$0xff] }
 0x115   : > { %874 = vst.msk [vmem:[#allocation2 + $0xe1] sm:$0xff] %vm800_vm2, %v785_v33  ;;  %v2407_v34 = vpop.f32.mrb[20].mxu0  ;;  %v1097_v30 = vld [vmem:[#allocation2 + $0x62] ss:$2 sm:$0xff]  ;;  %v1236_v33 = vsel %vm943_vm4, %v2259_v2, 0 }
 0x116   : > { %v730_v26 = vadd.f32 %v2407_v34, %v2910_v28  ;;  %v721_v35 = vpop.f32.mrb[21].mxu0  ;;  %v1109_v32 = vpack.c.bf16 %v1099_v24, %v1097_v30  ;;  %v1101_v34 = vld [vmem:[#allocation2 + $0xc2] ss:$2 sm:$0xff]  ;;  %v1644_v30 = vld [vmem:[#allocation2 + $0x61] ss:$2 sm:$0xff] }
 0x117   : > { %v722_v36 = vadd.f32 %v2910_v28, %v721_v35  ;;  %v2408_v37 = vpop.f32.mrb[22].mxu0  ;;  %v2264_v35 = vld [vmem:[%s3100_s5 + $0x8] sm:$0x3] }
 0x118   : > { %v790_v38 = vmax.f32 %v730_v26, 0.0  ;;  %v733_v39 = vadd.f32 %v2408_v37, %v2910_v28  ;;  %v724_v40 = vpop.f32.mrb[23].mxu0  ;;  %v1204_v37 = vld [vmem:[#allocation2 + $0x48] ss:$2 sm:$0xff] }
 0x119   : > { %v788_v41 = vmax.f32 %v722_v36, 0.0  ;;  %v725_v42 = vadd.f32 %v2910_v28, %v724_v40  ;;  %v1202_v40 = vld [vmem:[#allocation2 + $0x18] ss:$2 sm:$0xff] }
 0x11a   : > { %879 = vst.msk [vmem:[#allocation2 + $0x121] sm:$0xff] %vm800_vm2, %v790_v38  ;;  %v791_v43 = vmax.f32 %v733_v39, 0.0 }
 0x11b   : > { %877 = vst.msk [vmem:[#allocation2 + $0x109] sm:$0xff] %vm800_vm2, %v788_v41  ;;  %v789_v46 = vmax.f32 %v725_v42, 0.0  ;;  %v920_v47 = vld [vmem:[#allocation2 + $0xf1] ss:$2 sm:$0xff]  ;;  %v899_v48 = vld [vmem:[#allocation2 + $0xf0] ss:$2 sm:$0xff]  ;;  %v1217_v41 = vpack.c.bf16 %v1204_v37, %v1202_v40 }
 0x11c   : > { %880 = vst.msk [vmem:[#allocation2 + $0x129] sm:$0xff] %vm800_vm2, %v791_v43  ;;  %v927_v49 = vpack.c.bf16 %v920_v47, %v918_v44  ;;  %v906_v50 = vpack.c.bf16 %v899_v48, %v897_v45  ;;  %v1103_v25 = vld [vmem:[#allocation2 + $0xf2] ss:$2 sm:$0xff] }
 0x11d   : > { %878 = vst.msk [vmem:[#allocation2 + $0x111] sm:$0xff] %vm800_vm2, %v789_v46  ;;  %v2411_v51 = vpop.f32.mrb[24].mxu0  ;;  %v1110_v26 = vpack.c.bf16 %v1103_v25, %v1101_v34  ;;  %v1208_v42 = vld [vmem:[#allocation2 + $0xa8] ss:$2 sm:$0xff]  ;;  %v1206_v44 = vld [vmem:[#allocation2 + $0x78] ss:$2 sm:$0xff] }
 0x11e   : > { %v746_v52 = vadd.f32 %v2411_v51, %v2910_v28  ;;  %v737_v53 = vpop.f32.mrb[25].mxu0  ;;  %2423 = vmatprep.mubr.msk.bf16.mxu0 %vm800_vm2, %v927_v49  ;;  %2433 = vmatprep.mubr.msk.bf16.mxu1 %vm800_vm2, %v906_v50  ;;  %v1218_v45 = vpack.c.bf16 %v1208_v42, %v1206_v44  ;;  %v1346_v46 = vsel %vm943_vm4, %v2264_v35, 0  ;;  %v1210_v47 = vld [vmem:[#allocation2 + $0xd8] ss:$2 sm:$0xff]  ;;  %v2269_v49 = vld [vmem:[%s3100_s5 + $0xa] sm:$0x3] }
 0x11f   : > { %v738_v54 = vadd.f32 %v2910_v28, %v737_v53  ;;  %v2412_v55 = vpop.f32.mrb[26].mxu0  ;;  %v1314_v51 = vld [vmem:[#allocation2 + $0x49] ss:$2 sm:$0xff]  ;;  %v1430_v13 = vld [vmem:[#allocation2 + $0xda] ss:$2 sm:$0xff] }
 0x120   : > { %v794_v56 = vmax.f32 %v746_v52, 0.0  ;;  %v749_v57 = vadd.f32 %v2412_v55, %v2910_v28  ;;  %v740_v58 = vpop.f32.mrb[27].mxu0  ;;  %v2284_v25 = vld [vmem:[%s3100_s5 + $0x10] sm:$0x3]  ;;  %v1752_v44 = vld [vmem:[#allocation2 + $0x32] ss:$2 sm:$0xff] }
 0x121   : > { %v792_v59 = vmax.f32 %v738_v54, 0.0  ;;  %v741_v60 = vadd.f32 %v2910_v28, %v740_v58  ;;  %v1312_v54 = vld [vmem:[#allocation2 + $0x19] ss:$2 sm:$0xff]  ;;  %v1754_v42 = vld [vmem:[#allocation2 + $0x62] ss:$2 sm:$0xff] }
 0x122   : > { %883 = vst.msk [vmem:[#allocation2 + $0x151] sm:$0xff] %vm800_vm2, %v794_v56  ;;  %v795_v61 = vmax.f32 %v749_v57, 0.0  ;;  %v1327_v55 = vpack.c.bf16 %v1314_v51, %v1312_v54  ;;  %v1318_v56 = vld [vmem:[#allocation2 + $0xa9] ss:$2 sm:$0xff]  ;;  %v1316_v58 = vld [vmem:[#allocation2 + $0x79] ss:$2 sm:$0xff] }
 0x123   : > { %881 = vst.msk [vmem:[#allocation2 + $0x139] sm:$0xff] %vm800_vm2, %v792_v59  ;;  %v793_v62 = vmax.f32 %v741_v60, 0.0  ;;  %v922_v16 = vld [vmem:[#allocation2 + $0x121] ss:$2 sm:$0xff]  ;;  %v901_v17 = vld [vmem:[#allocation2 + $0x120] ss:$2 sm:$0xff]  ;;  %v1328_v59 = vpack.c.bf16 %v1318_v56, %v1316_v58 }
 0x124   : > { %884 = vst.msk [vmem:[#allocation2 + $0x159] sm:$0xff] %vm800_vm2, %v795_v61  ;;  %v1105_v38 = vld [vmem:[#allocation2 + $0x122] ss:$2 sm:$0xff]  ;;  %v1322_v57 = vld [vmem:[#allocation2 + $0x109] ss:$2 sm:$0xff]  ;;  %v1456_v60 = vsel %vm943_vm4, %v2269_v49, 0 }
 0x125   : > { %882 = vst.msk [vmem:[#allocation2 + $0x141] sm:$0xff] %vm800_vm2, %v793_v62  ;;  %v2415_v63 = vpop.f32.mrb[28].mxu0  ;;  %v1212_v43 = vld [vmem:[#allocation2 + $0x108] ss:$2 sm:$0xff]  ;;  %v1320_v61 = vld [vmem:[#allocation2 + $0xd9] ss:$2 sm:$0xff] }
 0x126   : > { %v762_v0 = vadd.f32 %v2415_v63, %v2910_v28  ;;  %v753_v1 = vpop.f32.mrb[29].mxu0  ;;  %v1219_v48 = vpack.c.bf16 %v1212_v43, %v1210_v47  ;;  %v1329_v62 = vpack.c.bf16 %v1322_v57, %v1320_v61  ;;  %v2274_v63 = vld [vmem:[%s3100_s5 + $0xc] sm:$0x3]  ;;  %v2297_v51 = vld [vmem:[%s3103_s8] ss:$0 sm:$0xff] }
 0x127   : > { %v754_v4 = vadd.f32 %v2910_v28, %v753_v1  ;;  %v2416_v5 = vpop.f32.mrb[30].mxu0  ;;  %v1424_v1 = vld [vmem:[#allocation2 + $0x4a] ss:$2 sm:$0xff]  ;;  %v1566_v12 = vsel %vm943_vm4, %v2274_v63, 0 }
 0x128   : > { %v798_v6 = vmax.f32 %v762_v0, 0.0  ;;  %v765_v7 = vadd.f32 %v2416_v5, %v2910_v28  ;;  %v756_v8 = vpop.f32.mrb[31].mxu0  ;;  %v1432_v9 = vld [vmem:[#allocation2 + $0x10a] ss:$2 sm:$0xff] }
 0x129   : > { %v796_v10 = vmax.f32 %v754_v4, 0.0  ;;  %v757_v11 = vadd.f32 %v2910_v28, %v756_v8  ;;  %v1127_v28 = vsel %vm943_vm4, %v2903_v27, 0  ;;  %v895_v27 = vld [vmem:[#allocation2 + $0x90] ss:$2 sm:$0xff]  ;;  %v1439_v14 = vpack.c.bf16 %v1432_v9, %v1430_v13  ;;  %v1889_v47 = vld [vmem:[%s2716_s26] ss:$2 sm:$0xff] }
 0x12a   : > { %887 = vst.msk [vmem:[#allocation2 + $0x181] sm:$0xff] %vm800_vm2, %v798_v6  ;;  %v799_v15 = vmax.f32 %v765_v7, 0.0  ;;  %v905_v31 = vpack.c.bf16 %v895_v27, %v893_v29  ;;  %v1422_v6 = vld [vmem:[#allocation2 + $0x1a] ss:$2 sm:$0xff]  ;;  %v1428_v8 = vld [vmem:[#allocation2 + $0xaa] ss:$2 sm:$0xff] }
 0x12b   : > { %885 = vst.msk [vmem:[#allocation2 + $0x169] sm:$0xff] %vm800_vm2, %v796_v10  ;;  %v797_v18 = vmax.f32 %v757_v11, 0.0  ;;  %v924_v19 = vld [vmem:[#allocation2 + $0x151] ss:$2 sm:$0xff]  ;;  %v903_v20 = vld [vmem:[#allocation2 + $0x150] ss:$2 sm:$0xff]  ;;  %v1437_v7 = vpack.c.bf16 %v1424_v1, %v1422_v6 }
 0x12c   : > { %888 = vst.msk [vmem:[#allocation2 + $0x189] sm:$0xff] %vm800_vm2, %v799_v15  ;;  %v928_v21 = vpack.c.bf16 %v924_v19, %v922_v16  ;;  %v907_v22 = vpack.c.bf16 %v903_v20, %v901_v17  ;;  %v1107_v36 = vld [vmem:[#allocation2 + $0x152] ss:$2 sm:$0xff]  ;;  %v1324_v4 = vld [vmem:[#allocation2 + $0x139] ss:$2 sm:$0xff] }
 0x12d   : > { %886 = vst.msk [vmem:[#allocation2 + $0x171] sm:$0xff] %vm800_vm2, %v797_v18  ;;  %v1111_v39 = vpack.c.bf16 %v1107_v36, %v1105_v38  ;;  %v1214_v52 = vld [vmem:[#allocation2 + $0x138] ss:$2 sm:$0xff]  ;;  %v2279_v15 = vld [vmem:[%s3100_s5 + $0xe] sm:$0x3]  ;;  %v1786_v38 = vsel %vm943_vm4, %v2284_v25, 0 }
 0x12e   : > { %2424 = vmatmul.mubr.msk.bf16.gmra.mrb[36].mxu0 %vm800_vm2, %v928_v21  ;;  %2434 = vmatmul.mubr.msk.bf16.vlgmr.msra.gmra.mrb[0].mxu1 %vm800_vm2, %v907_v22  ;;  %v1426_v10 = vld [vmem:[#allocation2 + $0x7a] ss:$2 sm:$0xff]  ;;  %v1646_v36 = vld [vmem:[#allocation2 + $0x91] ss:$2 sm:$0xff] }
 0x12f   : > { %2438 = vmatpush3.bf16.msra.mxu1 %v1127_v28  ;;  %2429 = vmatprep.mubr.msk.bf16.mxu0 %vm800_vm2, %v904_v23  ;;  %v1438_v11 = vpack.c.bf16 %v1428_v8, %v1426_v10  ;;  %v1534_v17 = vld [vmem:[#allocation2 + $0x60] ss:$2 sm:$0xff]  ;;  %v1532_v20 = vld [vmem:[#allocation2 + $0x30] ss:$2 sm:$0xff]  ;;  %v1654_v43 = vld [vmem:[#allocation2 + $0x151] ss:$2 sm:$0xff] }
 0x130   : > { %2439 = vmatprep.mubr.msk.bf16.mxu1 %vm800_vm2, %v1108_v3  ;;  %2606 = vmatprep.subr.msk.bf16.mxu1 %vm943_vm4, %v2259_v2  ;;  %v1434_v18 = vld [vmem:[#allocation2 + $0x13a] ss:$2 sm:$0xff]  ;;  %v1547_v21 = vpack.c.bf16 %v1534_v17, %v1532_v20  ;;  %v1676_v3 = vsel %vm943_vm4, %v2279_v15, 0 }
 0x131   : > { %v1538_v22 = vld [vmem:[#allocation2 + $0xc0] ss:$2 sm:$0xff]  ;;  %v1536_v23 = vld [vmem:[#allocation2 + $0x90] ss:$2 sm:$0xff] }
 0x132   : > { %v1542_v28 = vld [vmem:[#allocation2 + $0x120] ss:$2 sm:$0xff]  ;;  %v1548_v2 = vpack.c.bf16 %v1538_v22, %v1536_v23  ;;  %v1540_v27 = vld [vmem:[#allocation2 + $0xf0] ss:$2 sm:$0xff] }
 0x133   : > { %v1549_v24 = vpack.c.bf16 %v1542_v28, %v1540_v27  ;;  %v1546_v29 = vld [vmem:[#allocation2 + $0x180] ss:$2 sm:$0xff] }
 0x134   : > { %v1216_v50 = vld [vmem:[#allocation2 + $0x168] ss:$2 sm:$0xff]  ;;  %v1326_v0 = vld [vmem:[#allocation2 + $0x169] ss:$2 sm:$0xff] }
 0x135   : > { %v1220_v53 = vpack.c.bf16 %v1216_v50, %v1214_v52  ;;  %v1330_v5 = vpack.c.bf16 %v1326_v0, %v1324_v4  ;;  %v1436_v16 = vld [vmem:[#allocation2 + $0x16a] ss:$2 sm:$0xff]  ;;  %v2298_v52 = vld [vmem:[%s3104_s9] ss:$0 sm:$0xff] }
 0x136   : > { %2430 = vmatmul.mubr.msk.bf16.vlgmr.msra.gmra.mrb[32].mxu0 %vm800_vm2, %v905_v31  ;;  %2440 = vmatmul.mubr.msk.bf16.vlgmr.msra.gmra.mrb[4].mxu1 %vm800_vm2, %v1109_v32  ;;  %v1440_v19 = vpack.c.bf16 %v1436_v16, %v1434_v18  ;;  %v1544_v31 = vld [vmem:[#allocation2 + $0x150] ss:$2 sm:$0xff]  ;;  %v2291_v56 = vld [vmem:[%s2716_s26 + $0x40] ss:$2 sm:$0xff] }
 0x137   : > { %2448 = vmatpush3.bf16.msra.mxu1 %v1236_v33  ;;  %2443 = vmatprep.mubr.msk.bf16.mxu1 %vm800_vm2, %v1110_v26  ;;  %v1550_v32 = vpack.c.bf16 %v1546_v29, %v1544_v31  ;;  %v1642_v33 = vld [vmem:[#allocation2 + $0x31] ss:$2 sm:$0xff]  ;;  %v1648_v26 = vld [vmem:[#allocation2 + $0xc1] ss:$2 sm:$0xff]  ;;  %v2292_v57 = vld [vmem:[%s2716_s26 + $0x60] ss:$2 sm:$0xff]  ;;  %v1913_v58 = vmul.f32 %v2297_v51, %v2291_v56 }
 0x138   : > { %2607 = vmatprep.subr.msk.bf16.mxu1 %vm943_vm4, %v2264_v35  ;;  %v1657_v34 = vpack.c.bf16 %v1644_v30, %v1642_v33  ;;  %v1652_v35 = vld [vmem:[#allocation2 + $0x121] ss:$2 sm:$0xff]  ;;  %v1658_v37 = vpack.c.bf16 %v1648_v26, %v1646_v36  ;;  %v1762_v1 = vld [vmem:[#allocation2 + $0x122] ss:$2 sm:$0xff]  ;;  %v1756_v6 = vld [vmem:[#allocation2 + $0x92] ss:$2 sm:$0xff] }
 0x139   : > { %v1760_v10 = vld [vmem:[#allocation2 + $0xf2] ss:$2 sm:$0xff] }
 0x13a   : > { %v1764_v16 = vld [vmem:[#allocation2 + $0x152] ss:$2 sm:$0xff] }
 0x13b   : > { %v2293_v18 = vld [vmem:[%s2716_s26 + $0x80] ss:$2 sm:$0xff] }
 0x13c   : > { %v1915_v20 = vmul.f32 %v2297_v51, %v2293_v18  ;;  %v2295_v22 = vld [vmem:[%s2716_s26 + $0xc0] ss:$2 sm:$0xff] }
 0x13d   : > { %v2296_v28 = vld [vmem:[%s2716_s26 + $0xe0] ss:$2 sm:$0xff]  ;;  %v1917_v23 = vmul.f32 %v2297_v51, %v2295_v22 }
 0x13e   : > { %2444 = vmatmul.mubr.msk.bf16.gmra.mrb[0].mxu1 %vm800_vm2, %v1111_v39  ;;  %v1650_v39 = vld [vmem:[#allocation2 + $0xf1] ss:$2 sm:$0xff] }
 0x13f   : > { %2449 = vmatprep.mubr.msk.bf16.mxu1 %vm800_vm2, %v1217_v41  ;;  %v1659_v40 = vpack.c.bf16 %v1652_v35, %v1650_v39  ;;  %v1656_v41 = vld [vmem:[#allocation2 + $0x181] ss:$2 sm:$0xff] }
 0x146   : > { %2450 = vmatmul.mubr.msk.bf16.vlgmr.msra.gmra.mrb[4].mxu1 %vm800_vm2, %v1218_v45  ;;  %v1660_v45 = vpack.c.bf16 %v1656_v41, %v1654_v43  ;;  %v2289_v43 = vld [vmem:[%s3101_s6] ss:$0 sm:$0xff] }
 0x147   : > { %2458 = vmatpush3.bf16.msra.mxu1 %v1346_v46  ;;  %2453 = vmatprep.mubr.msk.bf16.mxu1 %vm800_vm2, %v1219_v48  ;;  %v1946_v46 = vld [vmem:[%s3105_s10] sm:$0xf] }
 0x148   : > { %2608 = vmatprep.subr.msk.bf16.mxu1 %vm943_vm4, %v2269_v49  ;;  %v2290_v48 = vld [vmem:[%s2716_s26 + $0x20] ss:$2 sm:$0xff]  ;;  %v1767_v49 = vpack.c.bf16 %v1754_v42, %v1752_v44  ;;  %2612 = vmatprep.subr.msk.bf16.mxu0 %vm603_vm0, %v1946_v46  ;;  %v1960_v50 = vsel %vm603_vm0, %v1946_v46, 0 }
 0x149   : > { %2508 = vmatpush3.bf16.msra.mxu0 %v1960_v50  ;;  %v1912_v54 = vmul.f32 %v2297_v51, %v2290_v48 }
 0x14b   : > { %v1927_v61 = vadd.f32 %v2298_v52, %v1912_v54 }
 0x14e   : > { %2454 = vmatmul.mubr.msk.bf16.gmra.mrb[0].mxu1 %vm800_vm2, %v1220_v53  ;;  %v1911_v53 = vmul.f32 %v2297_v51, %v1889_v47 }
 0x14f   : > { %2459 = vmatprep.mubr.msk.bf16.mxu1 %vm800_vm2, %v1327_v55  ;;  %v1888_v55 = vld [vmem:[%s3102_s7] sm:$0x3] }
 0x150   : > { %2613 = vmatprep.subr.msk.bf16.mxu0 %vm943_vm4, %v1888_v55 }
 0x156   : > { %2460 = vmatmul.mubr.msk.bf16.vlgmr.msra.gmra.mrb[4].mxu1 %vm800_vm2, %v1328_v59  ;;  %v1914_v59 = vmul.f32 %v2297_v51, %v2292_v57 }
 0x157   : > { %2468 = vmatpush3.bf16.msra.mxu1 %v1456_v60  ;;  %2463 = vmatprep.mubr.msk.bf16.mxu1 %vm800_vm2, %v1329_v62  ;;  %v1926_v60 = vadd.f32 %v2298_v52, %v1911_v53  ;;  %v1758_v62 = vld [vmem:[#allocation2 + $0xc2] ss:$2 sm:$0xff] }
 0x158   : > { %2609 = vmatprep.subr.msk.bf16.mxu1 %vm943_vm4, %v2274_v63  ;;  %v1928_v63 = vadd.f32 %v2298_v52, %v1913_v58  ;;  %v1929_v0 = vadd.f32 %v2298_v52, %v1914_v59  ;;  %v1768_v9 = vpack.c.bf16 %v1758_v62, %v1756_v6 }
 0x159   : > { %v1934_v4 = vmax.f32 %v1926_v60, 0.0 }
 0x15a   : > { %v1937_v8 = vmax.f32 %v1929_v0, 0.0 }
 0x15e   : > { %2464 = vmatmul.mubr.msk.bf16.gmra.mrb[0].mxu1 %vm800_vm2, %v1330_v5  ;;  %v1935_v5 = vmax.f32 %v1927_v61, 0.0 }
 0x15f   : > { %2469 = vmatprep.mubr.msk.bf16.mxu1 %vm800_vm2, %v1437_v7  ;;  %v1936_v7 = vmax.f32 %v1928_v63, 0.0 }
 0x161   : > { %v1943_v13 = vpack.c.bf16 %v1937_v8, %v1936_v7 }
 0x166   : > { %2470 = vmatmul.mubr.msk.bf16.vlgmr.msra.gmra.mrb[4].mxu1 %vm800_vm2, %v1438_v11  ;;  %v1942_v11 = vpack.c.bf16 %v1935_v5, %v1934_v4 }
 0x167   : > { %2478 = vmatpush3.bf16.msra.mxu1 %v1566_v12  ;;  %2473 = vmatprep.mubr.msk.bf16.mxu1 %vm800_vm2, %v1439_v14  ;;  %v1769_v12 = vpack.c.bf16 %v1762_v1, %v1760_v10  ;;  %v2040_v14 = vsel %vm943_vm4, %v1888_v55, 0 }
 0x168   : > { %2610 = vmatprep.subr.msk.bf16.mxu1 %vm943_vm4, %v2279_v15  ;;  %2509 = vmatprep.mubr.msk.bf16.mxu0 %vm554_vm1, %v1942_v11  ;;  %v1766_v15 = vld [vmem:[#allocation2 + $0x182] ss:$2 sm:$0xff] }
 0x169   : > { %2510 = vmatmul.mubr.msk.bf16.vlgmr.msra.gmra.mrb[40].mxu0 %vm554_vm1, %v1943_v13  ;;  %v1770_v17 = vpack.c.bf16 %v1766_v15, %v1764_v16 }
 0x16a   : > { %2518 = vmatpush3.bf16.msra.mxu0 %v2040_v14 }
 0x16e   : > { %2474 = vmatmul.mubr.msk.bf16.gmra.mrb[0].mxu1 %vm800_vm2, %v1440_v19  ;;  %v2294_v19 = vld [vmem:[%s2716_s26 + $0xa0] ss:$2 sm:$0xff] }
 0x16f   : > { %2479 = vmatprep.mubr.msk.bf16.mxu1 %vm800_vm2, %v1547_v21  ;;  %v1916_v21 = vmul.f32 %v2297_v51, %v2294_v19 }
 0x171   : > { %v1931_v27 = vadd.f32 %v2298_v52, %v1916_v21 }
 0x173   : > { %v1939_v30 = vmax.f32 %v1931_v27, 0.0 }
 0x176   : > { %2480 = vmatmul.mubr.msk.bf16.vlgmr.msra.gmra.mrb[4].mxu1 %vm800_vm2, %v1548_v2  ;;  %v1918_v2 = vmul.f32 %v2297_v51, %v2296_v28 }
 0x177   : > { %2488 = vmatpush3.bf16.msra.mxu1 %v1676_v3  ;;  %2483 = vmatprep.mubr.msk.bf16.mxu1 %vm800_vm2, %v1549_v24  ;;  %v1930_v3 = vadd.f32 %v2298_v52, %v1915_v20  ;;  %v1932_v24 = vadd.f32 %v2298_v52, %v1917_v23 }
 0x178   : > { %2611 = vmatprep.subr.msk.bf16.mxu1 %vm943_vm4, %v2284_v25  ;;  %v1933_v25 = vadd.f32 %v2298_v52, %v1918_v2 }
 0x179   : > { %v1938_v29 = vmax.f32 %v1930_v3, 0.0  ;;  %v1940_v31 = vmax.f32 %v1932_v24, 0.0 }
 0x17b   : > { %v1944_v33 = vpack.c.bf16 %v1939_v30, %v1938_v29 }
 0x17d   : > { %2513 = vmatprep.mubr.msk.bf16.mxu0 %vm554_vm1, %v1944_v33 }
 0x17e   : > { %2484 = vmatmul.mubr.msk.bf16.gmra.mrb[0].mxu1 %vm800_vm2, %v1550_v32  ;;  %v1941_v32 = vmax.f32 %v1933_v25, 0.0 }
 0x17f   : > { %2489 = vmatprep.mubr.msk.bf16.mxu1 %vm800_vm2, %v1657_v34 }
 0x180   : > { %v1945_v34 = vpack.c.bf16 %v1941_v32, %v1940_v31 }
 0x182   : > { %2514 = vmatmul.mubr.msk.bf16.gmra.mrb[44].mxu0 %vm554_vm1, %v1945_v34 }
 0x186   : > { %2490 = vmatmul.mubr.msk.bf16.vlgmr.msra.gmra.mrb[4].mxu1 %vm800_vm2, %v1658_v37 }
 0x187   : > { %2498 = vmatpush3.bf16.msra.mxu1 %v1786_v38  ;;  %2493 = vmatprep.mubr.msk.bf16.mxu1 %vm800_vm2, %v1659_v40 }
 0x18e   : > { %2494 = vmatmul.mubr.msk.bf16.gmra.mrb[0].mxu1 %vm800_vm2, %v1660_v45 }
 0x18f   : > { %2499 = vmatprep.mubr.msk.bf16.mxu1 %vm800_vm2, %v1767_v49 }
 0x196   : > { %2500 = vmatmul.mubr.msk.bf16.vlgmr.msra.gmra.mrb[4].mxu1 %vm800_vm2, %v1768_v9 }
 0x197   : > { %2503 = vmatprep.mubr.msk.bf16.mxu1 %vm800_vm2, %v1769_v12 }
 0x19e   : > { %2504 = vmatmul.mubr.msk.bf16.gmra.mrb[0].mxu1 %vm800_vm2, %v1770_v17 }
 0x201   : > { %v2425_v26 = vpop.f32.mrb[36].mxu0 }
 0x202   : > { %v997_v35 = vpop.f32.mrb[37].mxu0 }
 0x203   : > { %v2426_v36 = vpop.f32.mrb[38].mxu0 }
 0x204   : > { %v1000_v37 = vpop.f32.mrb[39].mxu0 }
 0x209   : > { %v2431_v38 = vpop.f32.mrb[32].mxu0 }
 0x20a   : > { %v1061_v39 = vpop.f32.mrb[33].mxu0 }
 0x20b   : > { %v2432_v40 = vpop.f32.mrb[34].mxu0 }
 0x20c   : > { %v1064_v41 = vpop.f32.mrb[35].mxu0 }
 0x269   : > { %v2501_v42 = vpop.f32.mrb[4].mxu1 }
 0x26a   : > { %v2529_v44 = vadd.f32 %v2501_v42, %v2431_v38  ;;  %v1822_v45 = vpop.f32.mrb[5].mxu1 }
 0x26b   : > { %v2530_v46 = vadd.f32 %v1822_v45, %v1061_v39  ;;  %v2502_v47 = vpop.f32.mrb[6].mxu1 }
 0x26c   : > { %v1870_v48 = vadd.f32 %v2529_v44, %v2289_v43  ;;  %v2531_v49 = vadd.f32 %v2502_v47, %v2432_v40  ;;  %v1825_v50 = vpop.f32.mrb[7].mxu1 }
 0x26d   : > { %v1868_v51 = vadd.f32 %v2530_v46, %v2289_v43  ;;  %v2532_v52 = vadd.f32 %v1825_v50, %v1064_v41 }
 0x26e   : > { %v1871_v53 = vadd.f32 %v2531_v49, %v2289_v43  ;;  %v1878_v55 = vmax.f32 %v1870_v48, 0.0 }
 0x26f   : > { %v1869_v54 = vadd.f32 %v2532_v52, %v2289_v43  ;;  %v1876_v57 = vmax.f32 %v1868_v51, 0.0 }
 0x270   : > { %v1879_v56 = vmax.f32 %v1871_v53, 0.0 }
 0x271   : > { %v1877_v58 = vmax.f32 %v1869_v54, 0.0  ;;  %v2505_v59 = vpop.f32.mrb[0].mxu1 }
 0x272   : > { %v1885_v60 = vpack.c.bf16 %v1879_v56, %v1878_v55  ;;  %v2533_v61 = vadd.f32 %v2505_v59, %v2425_v26  ;;  %v1838_v62 = vpop.f32.mrb[1].mxu1 }
 0x273   : > { %v1884_v63 = vpack.c.bf16 %v1877_v58, %v1876_v57  ;;  %v2534_v0 = vadd.f32 %v1838_v62, %v997_v35  ;;  %v2506_v1 = vpop.f32.mrb[2].mxu1 }
 0x274   : > { %v1874_v4 = vadd.f32 %v2533_v61, %v2289_v43  ;;  %v2535_v5 = vadd.f32 %v2506_v1, %v2426_v36  ;;  %v1841_v6 = vpop.f32.mrb[3].mxu1 }
 0x275   : > { %v1872_v7 = vadd.f32 %v2534_v0, %v2289_v43  ;;  %v2536_v8 = vadd.f32 %v1841_v6, %v1000_v37  ;;  %2519 = vmatprep.mubr.msk.bf16.mxu0 %vm800_vm2, %v1884_v63 }
 0x276   : > { %v1875_v9 = vadd.f32 %v2535_v5, %v2289_v43  ;;  %2520 = vmatmul.mubr.msk.bf16.vlgmr.msra.gmra.mrb[40].mxu0 %vm800_vm2, %v1885_v60  ;;  %v1882_v11 = vmax.f32 %v1874_v4, 0.0 }
 0x277   : > { %v1873_v10 = vadd.f32 %v2536_v8, %v2289_v43  ;;  %v1880_v13 = vmax.f32 %v1872_v7, 0.0 }
 0x278   : > { %v1883_v12 = vmax.f32 %v1875_v9, 0.0 }
 0x279   : > { %v1881_v14 = vmax.f32 %v1873_v10, 0.0 }
 0x27a   : > { %v1887_v15 = vpack.c.bf16 %v1883_v12, %v1882_v11 }
 0x27b   : > { %v1886_v16 = vpack.c.bf16 %v1881_v14, %v1880_v13 }
 0x27d   : > { %2523 = vmatprep.mubr.msk.bf16.mxu0 %vm800_vm2, %v1886_v16 }
 0x27e   : > { %2524 = vmatmul.mubr.msk.bf16.gmra.mrb[44].mxu0 %vm800_vm2, %v1887_v15 }
 0x349   : > { %v2521_v17 = vpop.f32.mrb[40].mxu0 }
 0x34a   : > { %2110 = vst.msk [vmem:[%s386_s29 + $0x10] sm:$0xff] %vm2107_vm5, %v2521_v17  ;;  %v2076_v18 = vpop.f32.mrb[41].mxu0 }
 0x34b   : > { %2108 = vst.msk [vmem:[%s386_s29] sm:$0xff] %vm2107_vm5, %v2076_v18  ;;  %v2522_v19 = vpop.f32.mrb[42].mxu0 }
 0x34c   : > { %2111 = vst.msk [vmem:[%s386_s29 + $0x18] sm:$0xff] %vm2107_vm5, %v2522_v19  ;;  %v2079_v20 = vpop.f32.mrb[43].mxu0 }
 0x34d   : > { %2109 = vst.msk [vmem:[%s386_s29 + $0x8] sm:$0xff] %vm2107_vm5, %v2079_v20 }
 0x351   : > { %v2525_v21 = vpop.f32.mrb[44].mxu0 }
 0x352   : > { %2114 = vst.msk [vmem:[%s386_s29 + $0x30] sm:$0xff] %vm2107_vm5, %v2525_v21  ;;  %v2092_v22 = vpop.f32.mrb[45].mxu0 }
 0x353   : > { %2112 = vst.msk [vmem:[%s386_s29 + $0x20] sm:$0xff] %vm2107_vm5, %v2092_v22  ;;  %v2526_v28 = vpop.f32.mrb[46].mxu0 }
 0x354   : > { %2115 = vst.msk [vmem:[%s386_s29 + $0x38] sm:$0xff] %vm2107_vm5, %v2526_v28  ;;  %v2095_v23 = vpop.f32.mrb[47].mxu0 }
 0x355   : > { %2113 = vst.msk [vmem:[%s386_s29 + $0x28] sm:$0xff] %vm2107_vm5, %v2095_v23 }
 0x356 PF: > { %s21_s17 = sadd.s32 1, %s2629_s17  }
 0x357   : > { %p18_p4 = scmp.ge.s32.totalorder %s21_s17, 4  }
 0x359   :  { %20 = sbr.rel (!%p18_p4) target bundleno = 1 (0x1), region = 180 }

</bundles_post_ra>
